<compile_context>
chip_gen: v7x
topology: tpu7x:2x2x1
jax: 0.10.0
libtpu: 0.0.40
codegen_flags: <defaults>
</compile_context>

<pallas_src>
import math

import jax
import jax.numpy as jnp
from jax import lax
from jax.experimental import pallas as pl
from jax.experimental.pallas import tpu as pltpu


def _round_up(v, m):
    return ((v + m - 1) // m) * m


def _pad_gate_cols(w, H, Hp):
    """Pad the trailing 4H gate axis of `w` to 4*Hp, gate by gate (zeros)."""
    if Hp == H:
        return w
    parts = jnp.split(w, 4, axis=-1)
    pad = [(0, 0)] * (w.ndim - 1) + [(0, Hp - H)]
    return jnp.concatenate([jnp.pad(p, pad) for p in parts], axis=-1)


def _make_lstm_kernel(Hp, Tb, unroll):
    """Recurrence-only LSTM kernel over one (batch block, time block)."""

    def kernel(ax_ref, h0_ref, wh_ref, out_ref, h_sc, c_sc):
        # Re-initialize the carried state at the first time block of this batch
        # block.  Grid axis 1 (time blocks) is sequential ("arbitrary").
        @pl.when(pl.program_id(1) == 0)
        def _():
            h_sc[...] = h0_ref[...].astype(jnp.float32)
            c_sc[...] = jnp.zeros_like(c_sc)

        wh = wh_ref[...]  # (Hp, 4Hp) — VMEM resident

        def step(tt, carry):
            h_prev = h_sc[...]          # (Nb, Hp) f32 carry
            c_prev = c_sc[...]

            # Only the recurrent projection lives in the serial chain; the
            # x @ Wx + b part was precomputed for all timesteps (ax_ref).
            a = ax_ref[tt].astype(jnp.float32) + jnp.dot(
                h_prev.astype(wh.dtype), wh,
                preferred_element_type=jnp.float32)          # (Nb, 4Hp) f32

            # Gate slices sit on 128-lane (Hp) boundaries -> pure EUP/VPU work.
            a_i = a[:, 0 * Hp:1 * Hp]
            a_f = a[:, 1 * Hp:2 * Hp]
            a_o = a[:, 2 * Hp:3 * Hp]
            a_g = a[:, 3 * Hp:4 * Hp]

            input_gate = jax.nn.sigmoid(a_i)
            forget_gate = jax.nn.sigmoid(a_f)
            output_gate = jax.nn.sigmoid(a_o)
            block_input = jnp.tanh(a_g)

            c_new = forget_gate * c_prev + input_gate * block_input
            h_new = output_gate * jnp.tanh(c_new)

            c_sc[...] = c_new
            h_sc[...] = h_new
            # Dynamic store along the leading (time) axis; lane-dense (Nb, Hp).
            out_ref[tt] = h_new.astype(out_ref.dtype)
            return carry

        lax.fori_loop(0, Tb, step, 0, unroll=unroll)

    return kernel


def lstm_forward_pallas(x, h0, Wx, Wh, b, *, compute_dtype=jnp.float32,
                        time_block=None, batch_block=None):
    """
    x:  (N, T, D)   h0: (N, H)   Wx: (D, 4H)   Wh: (H, 4H)   b: (4H,)
    returns h: (N, T, H)   (same semantics as the PyTorch lstm_forward: c0 = 0)
    """
    N, T, D = x.shape
    H = h0.shape[1]
    assert Wx.shape == (D, 4 * H)
    assert Wh.shape == (H, 4 * H)
    assert b.shape == (4 * H,)

    # ---- padded / aligned sizes -------------------------------------------
    Hp = _round_up(H, 128)              # lane-dense gates & output stores
    Np = _round_up(max(N, 8), 8)        # full f32 sublanes
    Tb = time_block if time_block is not None else min(T, 64)
    Tp = _round_up(T, Tb)
    n_tb = Tp // Tb
    Nb = Np if batch_block is None else batch_block
    assert Nb % 8 == 0 and Np % Nb == 0
    n_nb = Np // Nb

    cd = compute_dtype

    # ---- pad parameters (zero padding keeps padded gate lanes inert) -------
    Wxp = _pad_gate_cols(Wx, H, Hp)                                    # (D, 4Hp)
    Whp = _pad_gate_cols(jnp.pad(Wh, ((0, Hp - H), (0, 0))), H, Hp)    # (Hp, 4Hp)
    bp = _pad_gate_cols(b.reshape(1, -1), H, Hp)[0]                    # (4Hp,)

    x_p = jnp.pad(x, ((0, Np - N), (0, Tp - T), (0, 0)))               # (Np,Tp,D)
    h0_p = jnp.pad(h0, ((0, Np - N), (0, Hp - H)))                     # (Np, Hp)

    # ---- hoisted, time-parallel input projection ---------------------------
    # One large batched matmul (MXU-friendly), emitted directly in time-major
    # layout; f32 accumulation even when operands are lower precision.
    ax = jnp.einsum('ntd,dg->tng', x_p.astype(cd), Wxp.astype(cd),
                    preferred_element_type=jnp.float32) + bp           # (Tp,Np,4Hp)

    kernel = _make_lstm_kernel(Hp, Tb, unroll=Tb <= 16)

    out_tm = pl.pallas_call(
        kernel,
        out_shape=jax.ShapeDtypeStruct((Tp, Np, Hp), x.dtype),
        grid_spec=pltpu.PrefetchScalarGridSpec(
            num_scalar_prefetch=0,
            grid=(n_nb, n_tb),                       # (batch blocks, time blocks)
            in_specs=[
                # Precomputed gate pre-activations, one (Tb, Nb, 4Hp) slab/step.
                pl.BlockSpec((Tb, Nb, 4 * Hp), lambda nb, tb: (tb, nb, 0)),
                # h0 and Wh have constant block indices -> DMA'd once, resident.
                pl.BlockSpec((Nb, Hp), lambda nb, tb: (nb, 0)),
                pl.BlockSpec((Hp, 4 * Hp), lambda nb, tb: (0, 0)),
            ],
            out_specs=pl.BlockSpec((Tb, Nb, Hp), lambda nb, tb: (tb, nb, 0)),
            scratch_shapes=[
                pltpu.VMEM((Nb, Hp), jnp.float32),   # h carry (f32)
                pltpu.VMEM((Nb, Hp), jnp.float32),   # c carry (f32)
            ],
        ),
        compiler_params=pltpu.CompilerParams(
            # batch axis may be megacore-sharded; time MUST stay sequential.
            dimension_semantics=("parallel", "arbitrary"),
        ),
    )(ax, h0_p, Whp.astype(cd))

    # Undo padding.  The kernel stores lane-dense time-major slabs; the final
    # layout fix-up is on the (small) Hp-padded output only.
    return jnp.transpose(out_tm, (1, 0, 2))[:N, :T, :H]


def lstm_forward_ref(x, h0, Wx, Wh, b):
    """Pure-JAX f32 reference matching the PyTorch lstm_forward semantics."""
    N, T, D = x.shape
    H = h0.shape[1]
    h_t = h0.astype(jnp.float32)
    c_t = jnp.zeros_like(h_t)
    hs = []
    for t in range(T):
        a = (jnp.dot(x[:, t, :], Wx, preferred_element_type=jnp.float32)
             + jnp.dot(h_t, Wh, preferred_element_type=jnp.float32)
             + b)
        a_i, a_f, a_o, a_g = jnp.split(a, 4, axis=1)
        i = jax.nn.sigmoid(a_i)
        f = jax.nn.sigmoid(a_f)
        o = jax.nn.sigmoid(a_o)
        g = jnp.tanh(a_g)
        c_t = f * c_t + i * g
        h_t = o * jnp.tanh(c_t)
        hs.append(h_t)
    return jnp.stack(hs, axis=1).astype(x.dtype)


if __name__ == "__main__":
    # Small shapes consistent with the module's forward: N=2, T=8, D=16, H=32.
    N, T, D, H = 2, 8, 16, 32
    key = jax.random.PRNGKey(0)
    kx, kh0, kwx, kwh = jax.random.split(key, 4)

    x = jax.random.normal(kx, (N, T, D), dtype=jnp.float32)
    h0 = jax.random.normal(kh0, (N, H), dtype=jnp.float32)

    # Parameter init matching the PyTorch module: randn / sqrt(fan_in), zero bias.
    Wx = jax.random.normal(kwx, (D, 4 * H), dtype=jnp.float32) / math.sqrt(D)
    Wh = jax.random.normal(kwh, (H, 4 * H), dtype=jnp.float32) / math.sqrt(H)
    b = jnp.zeros((4 * H,), dtype=jnp.float32)

    # Exact f32 path: matches the PyTorch module numerics.
    out = jax.block_until_ready(
        lstm_forward_pallas(x, h0, Wx, Wh, b, compute_dtype=jnp.float32))
    ref = lstm_forward_ref(x, h0, Wx, Wh, b)
    assert out.shape == (N, T, H)
    assert jnp.allclose(out, ref, atol=1e-4, rtol=1e-4), "f32 mismatch"

    print("KERNEL_OK")
</pallas_src>

<mosaic_0001>
module attributes {stable_mosaic.version = 11 : i64} {
  func.func @kernel(%arg0: i32, %arg1: i32, %arg2: memref<8x8x512xf32, #tpu.memory_space<vmem>>, %arg3: memref<8x128xf32, #tpu.memory_space<vmem>>, %arg4: memref<128x512xf32, #tpu.memory_space<vmem>>, %arg5: memref<8x8x128xf32, #tpu.memory_space<vmem>>, %arg6: memref<8x128xf32, #tpu.memory_space<vmem>>, %arg7: memref<8x128xf32, #tpu.memory_space<vmem>>) attributes {dimension_semantics = [#tpu.dimension_semantics<parallel>, #tpu.dimension_semantics<arbitrary>], iteration_bounds = array<i64: 1, 1>, scalar_prefetch = 0 : i64, scratch_operands = 2 : i64, tpu.core_type = #tpu.core_type<tc>, window_params = [{transform_indices = @transform_0, window_bounds = array<i64: 8, 8, 512>}, {transform_indices = @transform_1, window_bounds = array<i64: 8, 128>}, {pipeline_mode = #tpu.pipeline_mode<synchronous>, transform_indices = @transform_2, window_bounds = array<i64: 128, 512>}, {transform_indices = @transform_3, window_bounds = array<i64: 8, 8, 128>}]} {
    %c0_i32 = arith.constant 0 : i32
    %0 = arith.cmpi eq, %arg1, %c0_i32 : i32
    %1 = arith.extui %0 : i1 to i32
    %c0_i32_0 = arith.constant 0 : i32
    %2 = arith.cmpi ne, %1, %c0_i32_0 : i32
    scf.if %2 {
      %c0_130 = arith.constant 0 : index
      %c0_131 = arith.constant 0 : index
      %308 = vector.load %arg3[%c0_130, %c0_131] : memref<8x128xf32, #tpu.memory_space<vmem>>, vector<8x128xf32>
      %c0_132 = arith.constant 0 : index
      %c0_133 = arith.constant 0 : index
      %309 = vector.load %arg6[%c0_132, %c0_133] : memref<8x128xf32, #tpu.memory_space<vmem>>, vector<8x128xf32>
      tpu.vector_store %arg6[%c0_132, %c0_133], %308 {strides = array<i32>} : memref<8x128xf32, #tpu.memory_space<vmem>>, vector<8x128xf32>,
      %cst_134 = arith.constant 0.000000e+00 : f32
      %310 = vector.broadcast %cst_134 : f32 to vector<8x128xf32>
      %c0_135 = arith.constant 0 : index
      %c0_136 = arith.constant 0 : index
      %311 = vector.load %arg7[%c0_135, %c0_136] : memref<8x128xf32, #tpu.memory_space<vmem>>, vector<8x128xf32>
      tpu.vector_store %arg7[%c0_135, %c0_136], %310 {strides = array<i32>} : memref<8x128xf32, #tpu.memory_space<vmem>>, vector<8x128xf32>,
    } else {
    }
    %c0 = arith.constant 0 : index
    %c0_1 = arith.constant 0 : index
    %3 = vector.load %arg4[%c0, %c0_1] : memref<128x512xf32, #tpu.memory_space<vmem>>, vector<128x512xf32>
    %c0_i32_2 = arith.constant 0 : i32
    %c0_3 = arith.constant 0 : index
    %c0_4 = arith.constant 0 : index
    %4 = vector.load %arg6[%c0_3, %c0_4] : memref<8x128xf32, #tpu.memory_space<vmem>>, vector<8x128xf32>
    %c0_5 = arith.constant 0 : index
    %c0_6 = arith.constant 0 : index
    %5 = vector.load %arg7[%c0_5, %c0_6] : memref<8x128xf32, #tpu.memory_space<vmem>>, vector<8x128xf32>
    %6 = arith.index_cast %c0_i32_2 : i32 to index
    %c0_7 = arith.constant 0 : index
    %c0_8 = arith.constant 0 : index
    %7 = vector.load %arg2[%6, %c0_7, %c0_8] : memref<8x8x512xf32, #tpu.memory_space<vmem>>, vector<1x8x512xf32>
    %8 = vector.shape_cast %7 : vector<1x8x512xf32> to vector<8x512xf32>
    %cst = arith.constant dense<0.000000e+00> : vector<8x512xf32>
    %9 = tpu.matmul %4, %3, %cst {dimension_numbers = #tpu.dot_dimension_numbers<[1], [0], [0], [1], [0, 0, 1, 1], [], []>} : vector<8x128xf32>, vector<128x512xf32>, vector<8x512xf32> -> vector<8x512xf32>
    %10 = arith.addf %8, %9 : vector<8x512xf32>
    %11 = vector.extract_strided_slice %10 {offsets = [0, 0], sizes = [8, 128], strides = [1, 1]} : vector<8x512xf32> to vector<8x128xf32>
    %12 = vector.extract_strided_slice %10 {offsets = [0, 128], sizes = [8, 128], strides = [1, 1]} : vector<8x512xf32> to vector<8x128xf32>
    %13 = vector.extract_strided_slice %10 {offsets = [0, 256], sizes = [8, 128], strides = [1, 1]} : vector<8x512xf32> to vector<8x128xf32>
    %14 = vector.extract_strided_slice %10 {offsets = [0, 384], sizes = [8, 128], strides = [1, 1]} : vector<8x512xf32> to vector<8x128xf32>
    %15 = arith.negf %11 : vector<8x128xf32>
    %16 = math.exp %15 : vector<8x128xf32>
    %cst_9 = arith.constant 1.000000e+00 : f32
    %17 = vector.broadcast %cst_9 : f32 to vector<8x128xf32>
    %18 = arith.addf %17, %16 : vector<8x128xf32>
    %19 = arith.divf %17, %18 : vector<8x128xf32>
    %20 = arith.negf %12 : vector<8x128xf32>
    %21 = math.exp %20 : vector<8x128xf32>
    %cst_10 = arith.constant 1.000000e+00 : f32
    %22 = vector.broadcast %cst_10 : f32 to vector<8x128xf32>
    %23 = arith.addf %22, %21 : vector<8x128xf32>
    %24 = arith.divf %22, %23 : vector<8x128xf32>
    %25 = arith.negf %13 : vector<8x128xf32>
    %26 = math.exp %25 : vector<8x128xf32>
    %cst_11 = arith.constant 1.000000e+00 : f32
    %27 = vector.broadcast %cst_11 : f32 to vector<8x128xf32>
    %28 = arith.addf %27, %26 : vector<8x128xf32>
    %29 = arith.divf %27, %28 : vector<8x128xf32>
    %30 = math.tanh %14 : vector<8x128xf32>
    %31 = arith.mulf %24, %5 : vector<8x128xf32>
    %32 = arith.mulf %19, %30 : vector<8x128xf32>
    %33 = arith.addf %31, %32 : vector<8x128xf32>
    %34 = math.tanh %33 : vector<8x128xf32>
    %35 = arith.mulf %29, %34 : vector<8x128xf32>
    %c0_12 = arith.constant 0 : index
    %c0_13 = arith.constant 0 : index
    %36 = vector.load %arg7[%c0_12, %c0_13] : memref<8x128xf32, #tpu.memory_space<vmem>>, vector<8x128xf32>
    tpu.vector_store %arg7[%c0_12, %c0_13], %33 {strides = array<i32>} : memref<8x128xf32, #tpu.memory_space<vmem>>, vector<8x128xf32>,
    %c0_14 = arith.constant 0 : index
    %c0_15 = arith.constant 0 : index
    %37 = vector.load %arg6[%c0_14, %c0_15] : memref<8x128xf32, #tpu.memory_space<vmem>>, vector<8x128xf32>
    tpu.vector_store %arg6[%c0_14, %c0_15], %35 {strides = array<i32>} : memref<8x128xf32, #tpu.memory_space<vmem>>, vector<8x128xf32>,
    %38 = arith.index_cast %c0_i32_2 : i32 to index
    %c0_16 = arith.constant 0 : index
    %c0_17 = arith.constant 0 : index
    %39 = vector.load %arg5[%38, %c0_16, %c0_17] : memref<8x8x128xf32, #tpu.memory_space<vmem>>, vector<1x8x128xf32>
    %40 = vector.shape_cast %39 : vector<1x8x128xf32> to vector<8x128xf32>
    %41 = vector.shape_cast %35 : vector<8x128xf32> to vector<1x8x128xf32>
    tpu.vector_store %arg5[%38, %c0_16, %c0_17], %41 {strides = array<i32>} : memref<8x8x128xf32, #tpu.memory_space<vmem>>, vector<1x8x128xf32>,
    %c1_i32 = arith.constant 1 : i32
    %c0_18 = arith.constant 0 : index
    %c0_19 = arith.constant 0 : index
    %42 = vector.load %arg6[%c0_18, %c0_19] : memref<8x128xf32, #tpu.memory_space<vmem>>, vector<8x128xf32>
    %c0_20 = arith.constant 0 : index
    %c0_21 = arith.constant 0 : index
    %43 = vector.load %arg7[%c0_20, %c0_21] : memref<8x128xf32, #tpu.memory_space<vmem>>, vector<8x128xf32>
    %44 = arith.index_cast %c1_i32 : i32 to index
    %c0_22 = arith.constant 0 : index
    %c0_23 = arith.constant 0 : index
    %45 = vector.load %arg2[%44, %c0_22, %c0_23] : memref<8x8x512xf32, #tpu.memory_space<vmem>>, vector<1x8x512xf32>
    %46 = vector.shape_cast %45 : vector<1x8x512xf32> to vector<8x512xf32>
    %cst_24 = arith.constant dense<0.000000e+00> : vector<8x512xf32>
    %47 = tpu.matmul %42, %3, %cst_24 {dimension_numbers = #tpu.dot_dimension_numbers<[1], [0], [0], [1], [0, 0, 1, 1], [], []>} : vector<8x128xf32>, vector<128x512xf32>, vector<8x512xf32> -> vector<8x512xf32>
    %48 = arith.addf %46, %47 : vector<8x512xf32>
    %49 = vector.extract_strided_slice %48 {offsets = [0, 0], sizes = [8, 128], strides = [1, 1]} : vector<8x512xf32> to vector<8x128xf32>
    %50 = vector.extract_strided_slice %48 {offsets = [0, 128], sizes = [8, 128], strides = [1, 1]} : vector<8x512xf32> to vector<8x128xf32>
    %51 = vector.extract_strided_slice %48 {offsets = [0, 256], sizes = [8, 128], strides = [1, 1]} : vector<8x512xf32> to vector<8x128xf32>
    %52 = vector.extract_strided_slice %48 {offsets = [0, 384], sizes = [8, 128], strides = [1, 1]} : vector<8x512xf32> to vector<8x128xf32>
    %53 = arith.negf %49 : vector<8x128xf32>
    %54 = math.exp %53 : vector<8x128xf32>
    %cst_25 = arith.constant 1.000000e+00 : f32
    %55 = vector.broadcast %cst_25 : f32 to vector<8x128xf32>
    %56 = arith.addf %55, %54 : vector<8x128xf32>
    %57 = arith.divf %55, %56 : vector<8x128xf32>
    %58 = arith.negf %50 : vector<8x128xf32>
    %59 = math.exp %58 : vector<8x128xf32>
    %cst_26 = arith.constant 1.000000e+00 : f32
    %60 = vector.broadcast %cst_26 : f32 to vector<8x128xf32>
    %61 = arith.addf %60, %59 : vector<8x128xf32>
    %62 = arith.divf %60, %61 : vector<8x128xf32>
    %63 = arith.negf %51 : vector<8x128xf32>
    %64 = math.exp %63 : vector<8x128xf32>
    %cst_27 = arith.constant 1.000000e+00 : f32
    %65 = vector.broadcast %cst_27 : f32 to vector<8x128xf32>
    %66 = arith.addf %65, %64 : vector<8x128xf32>
    %67 = arith.divf %65, %66 : vector<8x128xf32>
    %68 = math.tanh %52 : vector<8x128xf32>
    %69 = arith.mulf %62, %43 : vector<8x128xf32>
    %70 = arith.mulf %57, %68 : vector<8x128xf32>
    %71 = arith.addf %69, %70 : vector<8x128xf32>
    %72 = math.tanh %71 : vector<8x128xf32>
    %73 = arith.mulf %67, %72 : vector<8x128xf32>
    %c0_28 = arith.constant 0 : index
    %c0_29 = arith.constant 0 : index
    %74 = vector.load %arg7[%c0_28, %c0_29] : memref<8x128xf32, #tpu.memory_space<vmem>>, vector<8x128xf32>
    tpu.vector_store %arg7[%c0_28, %c0_29], %71 {strides = array<i32>} : memref<8x128xf32, #tpu.memory_space<vmem>>, vector<8x128xf32>,
    %c0_30 = arith.constant 0 : index
    %c0_31 = arith.constant 0 : index
    %75 = vector.load %arg6[%c0_30, %c0_31] : memref<8x128xf32, #tpu.memory_space<vmem>>, vector<8x128xf32>
    tpu.vector_store %arg6[%c0_30, %c0_31], %73 {strides = array<i32>} : memref<8x128xf32, #tpu.memory_space<vmem>>, vector<8x128xf32>,
    %76 = arith.index_cast %c1_i32 : i32 to index
    %c0_32 = arith.constant 0 : index
    %c0_33 = arith.constant 0 : index
    %77 = vector.load %arg5[%76, %c0_32, %c0_33] : memref<8x8x128xf32, #tpu.memory_space<vmem>>, vector<1x8x128xf32>
    %78 = vector.shape_cast %77 : vector<1x8x128xf32> to vector<8x128xf32>
    %79 = vector.shape_cast %73 : vector<8x128xf32> to vector<1x8x128xf32>
    tpu.vector_store %arg5[%76, %c0_32, %c0_33], %79 {strides = array<i32>} : memref<8x8x128xf32, #tpu.memory_space<vmem>>, vector<1x8x128xf32>,
    %c2_i32 = arith.constant 2 : i32
    %c0_34 = arith.constant 0 : index
    %c0_35 = arith.constant 0 : index
    %80 = vector.load %arg6[%c0_34, %c0_35] : memref<8x128xf32, #tpu.memory_space<vmem>>, vector<8x128xf32>
    %c0_36 = arith.constant 0 : index
    %c0_37 = arith.constant 0 : index
    %81 = vector.load %arg7[%c0_36, %c0_37] : memref<8x128xf32, #tpu.memory_space<vmem>>, vector<8x128xf32>
    %82 = arith.index_cast %c2_i32 : i32 to index
    %c0_38 = arith.constant 0 : index
    %c0_39 = arith.constant 0 : index
    %83 = vector.load %arg2[%82, %c0_38, %c0_39] : memref<8x8x512xf32, #tpu.memory_space<vmem>>, vector<1x8x512xf32>
    %84 = vector.shape_cast %83 : vector<1x8x512xf32> to vector<8x512xf32>
    %cst_40 = arith.constant dense<0.000000e+00> : vector<8x512xf32>
    %85 = tpu.matmul %80, %3, %cst_40 {dimension_numbers = #tpu.dot_dimension_numbers<[1], [0], [0], [1], [0, 0, 1, 1], [], []>} : vector<8x128xf32>, vector<128x512xf32>, vector<8x512xf32> -> vector<8x512xf32>
    %86 = arith.addf %84, %85 : vector<8x512xf32>
    %87 = vector.extract_strided_slice %86 {offsets = [0, 0], sizes = [8, 128], strides = [1, 1]} : vector<8x512xf32> to vector<8x128xf32>
    %88 = vector.extract_strided_slice %86 {offsets = [0, 128], sizes = [8, 128], strides = [1, 1]} : vector<8x512xf32> to vector<8x128xf32>
    %89 = vector.extract_strided_slice %86 {offsets = [0, 256], sizes = [8, 128], strides = [1, 1]} : vector<8x512xf32> to vector<8x128xf32>
    %90 = vector.extract_strided_slice %86 {offsets = [0, 384], sizes = [8, 128], strides = [1, 1]} : vector<8x512xf32> to vector<8x128xf32>
    %91 = arith.negf %87 : vector<8x128xf32>
    %92 = math.exp %91 : vector<8x128xf32>
    %cst_41 = arith.constant 1.000000e+00 : f32
    %93 = vector.broadcast %cst_41 : f32 to vector<8x128xf32>
    %94 = arith.addf %93, %92 : vector<8x128xf32>
    %95 = arith.divf %93, %94 : vector<8x128xf32>
    %96 = arith.negf %88 : vector<8x128xf32>
    %97 = math.exp %96 : vector<8x128xf32>
    %cst_42 = arith.constant 1.000000e+00 : f32
    %98 = vector.broadcast %cst_42 : f32 to vector<8x128xf32>
    %99 = arith.addf %98, %97 : vector<8x128xf32>
    %100 = arith.divf %98, %99 : vector<8x128xf32>
    %101 = arith.negf %89 : vector<8x128xf32>
    %102 = math.exp %101 : vector<8x128xf32>
    %cst_43 = arith.constant 1.000000e+00 : f32
    %103 = vector.broadcast %cst_43 : f32 to vector<8x128xf32>
    %104 = arith.addf %103, %102 : vector<8x128xf32>
    %105 = arith.divf %103, %104 : vector<8x128xf32>
    %106 = math.tanh %90 : vector<8x128xf32>
    %107 = arith.mulf %100, %81 : vector<8x128xf32>
    %108 = arith.mulf %95, %106 : vector<8x128xf32>
    %109 = arith.addf %107, %108 : vector<8x128xf32>
    %110 = math.tanh %109 : vector<8x128xf32>
    %111 = arith.mulf %105, %110 : vector<8x128xf32>
    %c0_44 = arith.constant 0 : index
    %c0_45 = arith.constant 0 : index
    %112 = vector.load %arg7[%c0_44, %c0_45] : memref<8x128xf32, #tpu.memory_space<vmem>>, vector<8x128xf32>
    tpu.vector_store %arg7[%c0_44, %c0_45], %109 {strides = array<i32>} : memref<8x128xf32, #tpu.memory_space<vmem>>, vector<8x128xf32>,
    %c0_46 = arith.constant 0 : index
    %c0_47 = arith.constant 0 : index
    %113 = vector.load %arg6[%c0_46, %c0_47] : memref<8x128xf32, #tpu.memory_space<vmem>>, vector<8x128xf32>
    tpu.vector_store %arg6[%c0_46, %c0_47], %111 {strides = array<i32>} : memref<8x128xf32, #tpu.memory_space<vmem>>, vector<8x128xf32>,
    %114 = arith.index_cast %c2_i32 : i32 to index
    %c0_48 = arith.constant 0 : index
    %c0_49 = arith.constant 0 : index
    %115 = vector.load %arg5[%114, %c0_48, %c0_49] : memref<8x8x128xf32, #tpu.memory_space<vmem>>, vector<1x8x128xf32>
    %116 = vector.shape_cast %115 : vector<1x8x128xf32> to vector<8x128xf32>
    %117 = vector.shape_cast %111 : vector<8x128xf32> to vector<1x8x128xf32>
    tpu.vector_store %arg5[%114, %c0_48, %c0_49], %117 {strides = array<i32>} : memref<8x8x128xf32, #tpu.memory_space<vmem>>, vector<1x8x128xf32>,
    %c3_i32 = arith.constant 3 : i32
    %c0_50 = arith.constant 0 : index
    %c0_51 = arith.constant 0 : index
    %118 = vector.load %arg6[%c0_50, %c0_51] : memref<8x128xf32, #tpu.memory_space<vmem>>, vector<8x128xf32>
    %c0_52 = arith.constant 0 : index
    %c0_53 = arith.constant 0 : index
    %119 = vector.load %arg7[%c0_52, %c0_53] : memref<8x128xf32, #tpu.memory_space<vmem>>, vector<8x128xf32>
    %120 = arith.index_cast %c3_i32 : i32 to index
    %c0_54 = arith.constant 0 : index
    %c0_55 = arith.constant 0 : index
    %121 = vector.load %arg2[%120, %c0_54, %c0_55] : memref<8x8x512xf32, #tpu.memory_space<vmem>>, vector<1x8x512xf32>
    %122 = vector.shape_cast %121 : vector<1x8x512xf32> to vector<8x512xf32>
    %cst_56 = arith.constant dense<0.000000e+00> : vector<8x512xf32>
    %123 = tpu.matmul %118, %3, %cst_56 {dimension_numbers = #tpu.dot_dimension_numbers<[1], [0], [0], [1], [0, 0, 1, 1], [], []>} : vector<8x128xf32>, vector<128x512xf32>, vector<8x512xf32> -> vector<8x512xf32>
    %124 = arith.addf %122, %123 : vector<8x512xf32>
    %125 = vector.extract_strided_slice %124 {offsets = [0, 0], sizes = [8, 128], strides = [1, 1]} : vector<8x512xf32> to vector<8x128xf32>
    %126 = vector.extract_strided_slice %124 {offsets = [0, 128], sizes = [8, 128], strides = [1, 1]} : vector<8x512xf32> to vector<8x128xf32>
    %127 = vector.extract_strided_slice %124 {offsets = [0, 256], sizes = [8, 128], strides = [1, 1]} : vector<8x512xf32> to vector<8x128xf32>
    %128 = vector.extract_strided_slice %124 {offsets = [0, 384], sizes = [8, 128], strides = [1, 1]} : vector<8x512xf32> to vector<8x128xf32>
    %129 = arith.negf %125 : vector<8x128xf32>
    %130 = math.exp %129 : vector<8x128xf32>
    %cst_57 = arith.constant 1.000000e+00 : f32
    %131 = vector.broadcast %cst_57 : f32 to vector<8x128xf32>
    %132 = arith.addf %131, %130 : vector<8x128xf32>
    %133 = arith.divf %131, %132 : vector<8x128xf32>
    %134 = arith.negf %126 : vector<8x128xf32>
    %135 = math.exp %134 : vector<8x128xf32>
    %cst_58 = arith.constant 1.000000e+00 : f32
    %136 = vector.broadcast %cst_58 : f32 to vector<8x128xf32>
    %137 = arith.addf %136, %135 : vector<8x128xf32>
    %138 = arith.divf %136, %137 : vector<8x128xf32>
    %139 = arith.negf %127 : vector<8x128xf32>
    %140 = math.exp %139 : vector<8x128xf32>
    %cst_59 = arith.constant 1.000000e+00 : f32
    %141 = vector.broadcast %cst_59 : f32 to vector<8x128xf32>
    %142 = arith.addf %141, %140 : vector<8x128xf32>
    %143 = arith.divf %141, %142 : vector<8x128xf32>
    %144 = math.tanh %128 : vector<8x128xf32>
    %145 = arith.mulf %138, %119 : vector<8x128xf32>
    %146 = arith.mulf %133, %144 : vector<8x128xf32>
    %147 = arith.addf %145, %146 : vector<8x128xf32>
    %148 = math.tanh %147 : vector<8x128xf32>
    %149 = arith.mulf %143, %148 : vector<8x128xf32>
    %c0_60 = arith.constant 0 : index
    %c0_61 = arith.constant 0 : index
    %150 = vector.load %arg7[%c0_60, %c0_61] : memref<8x128xf32, #tpu.memory_space<vmem>>, vector<8x128xf32>
    tpu.vector_store %arg7[%c0_60, %c0_61], %147 {strides = array<i32>} : memref<8x128xf32, #tpu.memory_space<vmem>>, vector<8x128xf32>,
    %c0_62 = arith.constant 0 : index
    %c0_63 = arith.constant 0 : index
    %151 = vector.load %arg6[%c0_62, %c0_63] : memref<8x128xf32, #tpu.memory_space<vmem>>, vector<8x128xf32>
    tpu.vector_store %arg6[%c0_62, %c0_63], %149 {strides = array<i32>} : memref<8x128xf32, #tpu.memory_space<vmem>>, vector<8x128xf32>,
    %152 = arith.index_cast %c3_i32 : i32 to index
    %c0_64 = arith.constant 0 : index
    %c0_65 = arith.constant 0 : index
    %153 = vector.load %arg5[%152, %c0_64, %c0_65] : memref<8x8x128xf32, #tpu.memory_space<vmem>>, vector<1x8x128xf32>
    %154 = vector.shape_cast %153 : vector<1x8x128xf32> to vector<8x128xf32>
    %155 = vector.shape_cast %149 : vector<8x128xf32> to vector<1x8x128xf32>
    tpu.vector_store %arg5[%152, %c0_64, %c0_65], %155 {strides = array<i32>} : memref<8x8x128xf32, #tpu.memory_space<vmem>>, vector<1x8x128xf32>,
    %c4_i32 = arith.constant 4 : i32
    %c0_66 = arith.constant 0 : index
    %c0_67 = arith.constant 0 : index
    %156 = vector.load %arg6[%c0_66, %c0_67] : memref<8x128xf32, #tpu.memory_space<vmem>>, vector<8x128xf32>
    %c0_68 = arith.constant 0 : index
    %c0_69 = arith.constant 0 : index
    %157 = vector.load %arg7[%c0_68, %c0_69] : memref<8x128xf32, #tpu.memory_space<vmem>>, vector<8x128xf32>
    %158 = arith.index_cast %c4_i32 : i32 to index
    %c0_70 = arith.constant 0 : index
    %c0_71 = arith.constant 0 : index
    %159 = vector.load %arg2[%158, %c0_70, %c0_71] : memref<8x8x512xf32, #tpu.memory_space<vmem>>, vector<1x8x512xf32>
    %160 = vector.shape_cast %159 : vector<1x8x512xf32> to vector<8x512xf32>
    %cst_72 = arith.constant dense<0.000000e+00> : vector<8x512xf32>
    %161 = tpu.matmul %156, %3, %cst_72 {dimension_numbers = #tpu.dot_dimension_numbers<[1], [0], [0], [1], [0, 0, 1, 1], [], []>} : vector<8x128xf32>, vector<128x512xf32>, vector<8x512xf32> -> vector<8x512xf32>
    %162 = arith.addf %160, %161 : vector<8x512xf32>
    %163 = vector.extract_strided_slice %162 {offsets = [0, 0], sizes = [8, 128], strides = [1, 1]} : vector<8x512xf32> to vector<8x128xf32>
    %164 = vector.extract_strided_slice %162 {offsets = [0, 128], sizes = [8, 128], strides = [1, 1]} : vector<8x512xf32> to vector<8x128xf32>
    %165 = vector.extract_strided_slice %162 {offsets = [0, 256], sizes = [8, 128], strides = [1, 1]} : vector<8x512xf32> to vector<8x128xf32>
    %166 = vector.extract_strided_slice %162 {offsets = [0, 384], sizes = [8, 128], strides = [1, 1]} : vector<8x512xf32> to vector<8x128xf32>
    %167 = arith.negf %163 : vector<8x128xf32>
    %168 = math.exp %167 : vector<8x128xf32>
    %cst_73 = arith.constant 1.000000e+00 : f32
    %169 = vector.broadcast %cst_73 : f32 to vector<8x128xf32>
    %170 = arith.addf %169, %168 : vector<8x128xf32>
    %171 = arith.divf %169, %170 : vector<8x128xf32>
    %172 = arith.negf %164 : vector<8x128xf32>
    %173 = math.exp %172 : vector<8x128xf32>
    %cst_74 = arith.constant 1.000000e+00 : f32
    %174 = vector.broadcast %cst_74 : f32 to vector<8x128xf32>
    %175 = arith.addf %174, %173 : vector<8x128xf32>
    %176 = arith.divf %174, %175 : vector<8x128xf32>
    %177 = arith.negf %165 : vector<8x128xf32>
    %178 = math.exp %177 : vector<8x128xf32>
    %cst_75 = arith.constant 1.000000e+00 : f32
    %179 = vector.broadcast %cst_75 : f32 to vector<8x128xf32>
    %180 = arith.addf %179, %178 : vector<8x128xf32>
    %181 = arith.divf %179, %180 : vector<8x128xf32>
    %182 = math.tanh %166 : vector<8x128xf32>
    %183 = arith.mulf %176, %157 : vector<8x128xf32>
    %184 = arith.mulf %171, %182 : vector<8x128xf32>
    %185 = arith.addf %183, %184 : vector<8x128xf32>
    %186 = math.tanh %185 : vector<8x128xf32>
    %187 = arith.mulf %181, %186 : vector<8x128xf32>
    %c0_76 = arith.constant 0 : index
    %c0_77 = arith.constant 0 : index
    %188 = vector.load %arg7[%c0_76, %c0_77] : memref<8x128xf32, #tpu.memory_space<vmem>>, vector<8x128xf32>
    tpu.vector_store %arg7[%c0_76, %c0_77], %185 {strides = array<i32>} : memref<8x128xf32, #tpu.memory_space<vmem>>, vector<8x128xf32>,
    %c0_78 = arith.constant 0 : index
    %c0_79 = arith.constant 0 : index
    %189 = vector.load %arg6[%c0_78, %c0_79] : memref<8x128xf32, #tpu.memory_space<vmem>>, vector<8x128xf32>
    tpu.vector_store %arg6[%c0_78, %c0_79], %187 {strides = array<i32>} : memref<8x128xf32, #tpu.memory_space<vmem>>, vector<8x128xf32>,
    %190 = arith.index_cast %c4_i32 : i32 to index
    %c0_80 = arith.constant 0 : index
    %c0_81 = arith.constant 0 : index
    %191 = vector.load %arg5[%190, %c0_80, %c0_81] : memref<8x8x128xf32, #tpu.memory_space<vmem>>, vector<1x8x128xf32>
    %192 = vector.shape_cast %191 : vector<1x8x128xf32> to vector<8x128xf32>
    %193 = vector.shape_cast %187 : vector<8x128xf32> to vector<1x8x128xf32>
    tpu.vector_store %arg5[%190, %c0_80, %c0_81], %193 {strides = array<i32>} : memref<8x8x128xf32, #tpu.memory_space<vmem>>, vector<1x8x128xf32>,
    %c5_i32 = arith.constant 5 : i32
    %c0_82 = arith.constant 0 : index
    %c0_83 = arith.constant 0 : index
    %194 = vector.load %arg6[%c0_82, %c0_83] : memref<8x128xf32, #tpu.memory_space<vmem>>, vector<8x128xf32>
    %c0_84 = arith.constant 0 : index
    %c0_85 = arith.constant 0 : index
    %195 = vector.load %arg7[%c0_84, %c0_85] : memref<8x128xf32, #tpu.memory_space<vmem>>, vector<8x128xf32>
    %196 = arith.index_cast %c5_i32 : i32 to index
    %c0_86 = arith.constant 0 : index
    %c0_87 = arith.constant 0 : index
    %197 = vector.load %arg2[%196, %c0_86, %c0_87] : memref<8x8x512xf32, #tpu.memory_space<vmem>>, vector<1x8x512xf32>
    %198 = vector.shape_cast %197 : vector<1x8x512xf32> to vector<8x512xf32>
    %cst_88 = arith.constant dense<0.000000e+00> : vector<8x512xf32>
    %199 = tpu.matmul %194, %3, %cst_88 {dimension_numbers = #tpu.dot_dimension_numbers<[1], [0], [0], [1], [0, 0, 1, 1], [], []>} : vector<8x128xf32>, vector<128x512xf32>, vector<8x512xf32> -> vector<8x512xf32>
    %200 = arith.addf %198, %199 : vector<8x512xf32>
    %201 = vector.extract_strided_slice %200 {offsets = [0, 0], sizes = [8, 128], strides = [1, 1]} : vector<8x512xf32> to vector<8x128xf32>
    %202 = vector.extract_strided_slice %200 {offsets = [0, 128], sizes = [8, 128], strides = [1, 1]} : vector<8x512xf32> to vector<8x128xf32>
    %203 = vector.extract_strided_slice %200 {offsets = [0, 256], sizes = [8, 128], strides = [1, 1]} : vector<8x512xf32> to vector<8x128xf32>
    %204 = vector.extract_strided_slice %200 {offsets = [0, 384], sizes = [8, 128], strides = [1, 1]} : vector<8x512xf32> to vector<8x128xf32>
    %205 = arith.negf %201 : vector<8x128xf32>
    %206 = math.exp %205 : vector<8x128xf32>
    %cst_89 = arith.constant 1.000000e+00 : f32
    %207 = vector.broadcast %cst_89 : f32 to vector<8x128xf32>
    %208 = arith.addf %207, %206 : vector<8x128xf32>
    %209 = arith.divf %207, %208 : vector<8x128xf32>
    %210 = arith.negf %202 : vector<8x128xf32>
    %211 = math.exp %210 : vector<8x128xf32>
    %cst_90 = arith.constant 1.000000e+00 : f32
    %212 = vector.broadcast %cst_90 : f32 to vector<8x128xf32>
    %213 = arith.addf %212, %211 : vector<8x128xf32>
    %214 = arith.divf %212, %213 : vector<8x128xf32>
    %215 = arith.negf %203 : vector<8x128xf32>
    %216 = math.exp %215 : vector<8x128xf32>
    %cst_91 = arith.constant 1.000000e+00 : f32
    %217 = vector.broadcast %cst_91 : f32 to vector<8x128xf32>
    %218 = arith.addf %217, %216 : vector<8x128xf32>
    %219 = arith.divf %217, %218 : vector<8x128xf32>
    %220 = math.tanh %204 : vector<8x128xf32>
    %221 = arith.mulf %214, %195 : vector<8x128xf32>
    %222 = arith.mulf %209, %220 : vector<8x128xf32>
    %223 = arith.addf %221, %222 : vector<8x128xf32>
    %224 = math.tanh %223 : vector<8x128xf32>
    %225 = arith.mulf %219, %224 : vector<8x128xf32>
    %c0_92 = arith.constant 0 : index
    %c0_93 = arith.constant 0 : index
    %226 = vector.load %arg7[%c0_92, %c0_93] : memref<8x128xf32, #tpu.memory_space<vmem>>, vector<8x128xf32>
    tpu.vector_store %arg7[%c0_92, %c0_93], %223 {strides = array<i32>} : memref<8x128xf32, #tpu.memory_space<vmem>>, vector<8x128xf32>,
    %c0_94 = arith.constant 0 : index
    %c0_95 = arith.constant 0 : index
    %227 = vector.load %arg6[%c0_94, %c0_95] : memref<8x128xf32, #tpu.memory_space<vmem>>, vector<8x128xf32>
    tpu.vector_store %arg6[%c0_94, %c0_95], %225 {strides = array<i32>} : memref<8x128xf32, #tpu.memory_space<vmem>>, vector<8x128xf32>,
    %228 = arith.index_cast %c5_i32 : i32 to index
    %c0_96 = arith.constant 0 : index
    %c0_97 = arith.constant 0 : index
    %229 = vector.load %arg5[%228, %c0_96, %c0_97] : memref<8x8x128xf32, #tpu.memory_space<vmem>>, vector<1x8x128xf32>
    %230 = vector.shape_cast %229 : vector<1x8x128xf32> to vector<8x128xf32>
    %231 = vector.shape_cast %225 : vector<8x128xf32> to vector<1x8x128xf32>
    tpu.vector_store %arg5[%228, %c0_96, %c0_97], %231 {strides = array<i32>} : memref<8x8x128xf32, #tpu.memory_space<vmem>>, vector<1x8x128xf32>,
    %c6_i32 = arith.constant 6 : i32
    %c0_98 = arith.constant 0 : index
    %c0_99 = arith.constant 0 : index
    %232 = vector.load %arg6[%c0_98, %c0_99] : memref<8x128xf32, #tpu.memory_space<vmem>>, vector<8x128xf32>
    %c0_100 = arith.constant 0 : index
    %c0_101 = arith.constant 0 : index
    %233 = vector.load %arg7[%c0_100, %c0_101] : memref<8x128xf32, #tpu.memory_space<vmem>>, vector<8x128xf32>
    %234 = arith.index_cast %c6_i32 : i32 to index
    %c0_102 = arith.constant 0 : index
    %c0_103 = arith.constant 0 : index
    %235 = vector.load %arg2[%234, %c0_102, %c0_103] : memref<8x8x512xf32, #tpu.memory_space<vmem>>, vector<1x8x512xf32>
    %236 = vector.shape_cast %235 : vector<1x8x512xf32> to vector<8x512xf32>
    %cst_104 = arith.constant dense<0.000000e+00> : vector<8x512xf32>
    %237 = tpu.matmul %232, %3, %cst_104 {dimension_numbers = #tpu.dot_dimension_numbers<[1], [0], [0], [1], [0, 0, 1, 1], [], []>} : vector<8x128xf32>, vector<128x512xf32>, vector<8x512xf32> -> vector<8x512xf32>
    %238 = arith.addf %236, %237 : vector<8x512xf32>
    %239 = vector.extract_strided_slice %238 {offsets = [0, 0], sizes = [8, 128], strides = [1, 1]} : vector<8x512xf32> to vector<8x128xf32>
    %240 = vector.extract_strided_slice %238 {offsets = [0, 128], sizes = [8, 128], strides = [1, 1]} : vector<8x512xf32> to vector<8x128xf32>
    %241 = vector.extract_strided_slice %238 {offsets = [0, 256], sizes = [8, 128], strides = [1, 1]} : vector<8x512xf32> to vector<8x128xf32>
    %242 = vector.extract_strided_slice %238 {offsets = [0, 384], sizes = [8, 128], strides = [1, 1]} : vector<8x512xf32> to vector<8x128xf32>
    %243 = arith.negf %239 : vector<8x128xf32>
    %244 = math.exp %243 : vector<8x128xf32>
    %cst_105 = arith.constant 1.000000e+00 : f32
    %245 = vector.broadcast %cst_105 : f32 to vector<8x128xf32>
    %246 = arith.addf %245, %244 : vector<8x128xf32>
    %247 = arith.divf %245, %246 : vector<8x128xf32>
    %248 = arith.negf %240 : vector<8x128xf32>
    %249 = math.exp %248 : vector<8x128xf32>
    %cst_106 = arith.constant 1.000000e+00 : f32
    %250 = vector.broadcast %cst_106 : f32 to vector<8x128xf32>
    %251 = arith.addf %250, %249 : vector<8x128xf32>
    %252 = arith.divf %250, %251 : vector<8x128xf32>
    %253 = arith.negf %241 : vector<8x128xf32>
    %254 = math.exp %253 : vector<8x128xf32>
    %cst_107 = arith.constant 1.000000e+00 : f32
    %255 = vector.broadcast %cst_107 : f32 to vector<8x128xf32>
    %256 = arith.addf %255, %254 : vector<8x128xf32>
    %257 = arith.divf %255, %256 : vector<8x128xf32>
    %258 = math.tanh %242 : vector<8x128xf32>
    %259 = arith.mulf %252, %233 : vector<8x128xf32>
    %260 = arith.mulf %247, %258 : vector<8x128xf32>
    %261 = arith.addf %259, %260 : vector<8x128xf32>
    %262 = math.tanh %261 : vector<8x128xf32>
    %263 = arith.mulf %257, %262 : vector<8x128xf32>
    %c0_108 = arith.constant 0 : index
    %c0_109 = arith.constant 0 : index
    %264 = vector.load %arg7[%c0_108, %c0_109] : memref<8x128xf32, #tpu.memory_space<vmem>>, vector<8x128xf32>
    tpu.vector_store %arg7[%c0_108, %c0_109], %261 {strides = array<i32>} : memref<8x128xf32, #tpu.memory_space<vmem>>, vector<8x128xf32>,
    %c0_110 = arith.constant 0 : index
    %c0_111 = arith.constant 0 : index
    %265 = vector.load %arg6[%c0_110, %c0_111] : memref<8x128xf32, #tpu.memory_space<vmem>>, vector<8x128xf32>
    tpu.vector_store %arg6[%c0_110, %c0_111], %263 {strides = array<i32>} : memref<8x128xf32, #tpu.memory_space<vmem>>, vector<8x128xf32>,
    %266 = arith.index_cast %c6_i32 : i32 to index
    %c0_112 = arith.constant 0 : index
    %c0_113 = arith.constant 0 : index
    %267 = vector.load %arg5[%266, %c0_112, %c0_113] : memref<8x8x128xf32, #tpu.memory_space<vmem>>, vector<1x8x128xf32>
    %268 = vector.shape_cast %267 : vector<1x8x128xf32> to vector<8x128xf32>
    %269 = vector.shape_cast %263 : vector<8x128xf32> to vector<1x8x128xf32>
    tpu.vector_store %arg5[%266, %c0_112, %c0_113], %269 {strides = array<i32>} : memref<8x8x128xf32, #tpu.memory_space<vmem>>, vector<1x8x128xf32>,
    %c7_i32 = arith.constant 7 : i32
    %c0_114 = arith.constant 0 : index
    %c0_115 = arith.constant 0 : index
    %270 = vector.load %arg6[%c0_114, %c0_115] : memref<8x128xf32, #tpu.memory_space<vmem>>, vector<8x128xf32>
    %c0_116 = arith.constant 0 : index
    %c0_117 = arith.constant 0 : index
    %271 = vector.load %arg7[%c0_116, %c0_117] : memref<8x128xf32, #tpu.memory_space<vmem>>, vector<8x128xf32>
    %272 = arith.index_cast %c7_i32 : i32 to index
    %c0_118 = arith.constant 0 : index
    %c0_119 = arith.constant 0 : index
    %273 = vector.load %arg2[%272, %c0_118, %c0_119] : memref<8x8x512xf32, #tpu.memory_space<vmem>>, vector<1x8x512xf32>
    %274 = vector.shape_cast %273 : vector<1x8x512xf32> to vector<8x512xf32>
    %cst_120 = arith.constant dense<0.000000e+00> : vector<8x512xf32>
    %275 = tpu.matmul %270, %3, %cst_120 {dimension_numbers = #tpu.dot_dimension_numbers<[1], [0], [0], [1], [0, 0, 1, 1], [], []>} : vector<8x128xf32>, vector<128x512xf32>, vector<8x512xf32> -> vector<8x512xf32>
    %276 = arith.addf %274, %275 : vector<8x512xf32>
    %277 = vector.extract_strided_slice %276 {offsets = [0, 0], sizes = [8, 128], strides = [1, 1]} : vector<8x512xf32> to vector<8x128xf32>
    %278 = vector.extract_strided_slice %276 {offsets = [0, 128], sizes = [8, 128], strides = [1, 1]} : vector<8x512xf32> to vector<8x128xf32>
    %279 = vector.extract_strided_slice %276 {offsets = [0, 256], sizes = [8, 128], strides = [1, 1]} : vector<8x512xf32> to vector<8x128xf32>
    %280 = vector.extract_strided_slice %276 {offsets = [0, 384], sizes = [8, 128], strides = [1, 1]} : vector<8x512xf32> to vector<8x128xf32>
    %281 = arith.negf %277 : vector<8x128xf32>
    %282 = math.exp %281 : vector<8x128xf32>
    %cst_121 = arith.constant 1.000000e+00 : f32
    %283 = vector.broadcast %cst_121 : f32 to vector<8x128xf32>
    %284 = arith.addf %283, %282 : vector<8x128xf32>
    %285 = arith.divf %283, %284 : vector<8x128xf32>
    %286 = arith.negf %278 : vector<8x128xf32>
    %287 = math.exp %286 : vector<8x128xf32>
    %cst_122 = arith.constant 1.000000e+00 : f32
    %288 = vector.broadcast %cst_122 : f32 to vector<8x128xf32>
    %289 = arith.addf %288, %287 : vector<8x128xf32>
    %290 = arith.divf %288, %289 : vector<8x128xf32>
    %291 = arith.negf %279 : vector<8x128xf32>
    %292 = math.exp %291 : vector<8x128xf32>
    %cst_123 = arith.constant 1.000000e+00 : f32
    %293 = vector.broadcast %cst_123 : f32 to vector<8x128xf32>
    %294 = arith.addf %293, %292 : vector<8x128xf32>
    %295 = arith.divf %293, %294 : vector<8x128xf32>
    %296 = math.tanh %280 : vector<8x128xf32>
    %297 = arith.mulf %290, %271 : vector<8x128xf32>
    %298 = arith.mulf %285, %296 : vector<8x128xf32>
    %299 = arith.addf %297, %298 : vector<8x128xf32>
    %300 = math.tanh %299 : vector<8x128xf32>
    %301 = arith.mulf %295, %300 : vector<8x128xf32>
    %c0_124 = arith.constant 0 : index
    %c0_125 = arith.constant 0 : index
    %302 = vector.load %arg7[%c0_124, %c0_125] : memref<8x128xf32, #tpu.memory_space<vmem>>, vector<8x128xf32>
    tpu.vector_store %arg7[%c0_124, %c0_125], %299 {strides = array<i32>} : memref<8x128xf32, #tpu.memory_space<vmem>>, vector<8x128xf32>,
    %c0_126 = arith.constant 0 : index
    %c0_127 = arith.constant 0 : index
    %303 = vector.load %arg6[%c0_126, %c0_127] : memref<8x128xf32, #tpu.memory_space<vmem>>, vector<8x128xf32>
    tpu.vector_store %arg6[%c0_126, %c0_127], %301 {strides = array<i32>} : memref<8x128xf32, #tpu.memory_space<vmem>>, vector<8x128xf32>,
    %304 = arith.index_cast %c7_i32 : i32 to index
    %c0_128 = arith.constant 0 : index
    %c0_129 = arith.constant 0 : index
    %305 = vector.load %arg5[%304, %c0_128, %c0_129] : memref<8x8x128xf32, #tpu.memory_space<vmem>>, vector<1x8x128xf32>
    %306 = vector.shape_cast %305 : vector<1x8x128xf32> to vector<8x128xf32>
    %307 = vector.shape_cast %301 : vector<8x128xf32> to vector<1x8x128xf32>
    tpu.vector_store %arg5[%304, %c0_128, %c0_129], %307 {strides = array<i32>} : memref<8x8x128xf32, #tpu.memory_space<vmem>>, vector<1x8x128xf32>,
    %c8_i32 = arith.constant 8 : i32
    return
  }
  func.func @transform_0(%arg0: i32, %arg1: i32) -> (i32, i32, i32) {
    %c0_i32 = arith.constant 0 : i32
    %c0_i32_0 = arith.constant 0 : i32
    return %arg1, %arg0, %c0_i32 : i32, i32, i32
  }
  func.func @transform_1(%arg0: i32, %arg1: i32) -> (i32, i32) {
    %c0_i32 = arith.constant 0 : i32
    %c0_i32_0 = arith.constant 0 : i32
    return %arg0, %c0_i32 : i32, i32
  }
  func.func @transform_2(%arg0: i32, %arg1: i32) -> (i32, i32) {
    %c0_i32 = arith.constant 0 : i32
    %c0_i32_0 = arith.constant 0 : i32
    %c0_i32_1 = arith.constant 0 : i32
    return %c0_i32, %c0_i32_0 : i32, i32
  }
  func.func @transform_3(%arg0: i32, %arg1: i32) -> (i32, i32, i32) {
    %c0_i32 = arith.constant 0 : i32
    %c0_i32_0 = arith.constant 0 : i32
    return %arg1, %arg0, %c0_i32 : i32, i32, i32
  }
}

</mosaic_0001>

<bundles_post_ra>
// kernel: tpu_custom_call.1
= control target key start
LH: loop header
LB: loop body
LE: loop exit
PB: predicated region body
PF: predicated region fallthrough
CT: control target
= control target key end

     0   :  { %8 = vsyncpa [#allocation5], 0  ;;  %s2800_s0 = inlined_call_operand.hbm [shape: f32[8,8,512], index: 0, kind: input, shape index: {}]   ;;  %s2801_s1 = inlined_call_operand.hbm [shape: f32[8,128], index: 1, kind: input, shape index: {}]   ;;  %s2802_s2 = inlined_call_operand.hbm [shape: f32[128,512], index: 2, kind: input, shape index: {}]   ;;  %s2803_s3 = inlined_call_operand.hbm [shape: f32[8,8,128], index: 3, kind: output, shape index: {}]  }
   0x1   :  { %9 = vsyncpa [#allocation8], 0 }
   0x2   :  { %10 = vsyncpa [#allocation6], 0  ;;  %s2356_s12 = smov [#allocation7]   ;;  %s2357_s14 = smov [#allocation4]  }
   0x3   :  { %s29_s13 = sshll.u32 %s2356_s12, 4  ;;  %s16_s15 = sshll.u32 %s2357_s14, 4  ;;  %s30_s13 = int_to_ptr.vmem [resolvable:$true] %s29_s13  ;;  %s2385_s15 = int_to_ptr.vmem [resolvable:$true] %s16_s15 }
   0x4   :  { %s2262_s18 = scalar_lea.hbm %s2801_s1, 128 }
   0x5   :  { %p2263_p0 = scmp.ne.s32.totalorder %s2801_s1, %s2262_s18  ;;  %p2266_p1 = scmp.lt.u32.totalorder %s2262_s18, %s2801_s1 }
   0x7   :  { %p2268_p2 = pnand %p2266_p1, %p2263_p0 }
   0x9   :  { %2271 = shalt.err (!%p2268_p2)
}
   0xa   :  { %s2272_s23 = scalar_lea.vmem %s30_s13, 128  ;;  %p2277_p4 = scmp.lt.s32.totalorder %s30_s13, %s30_s13 }
   0xb   :  { %p2273_p3 = scmp.ne.s32.totalorder %s30_s13, %s2272_s23  ;;  %p2278_p5 = scmp.lt.s32.totalorder %s2272_s23, %s2272_s23 }
   0xd   :  { %p2279_p6 = por %p2278_p5, %p2277_p4 }
   0xf   :  { %p2280_p7 = pnand %p2279_p6, %p2273_p3 }
  0x11   :  { %2283 = shalt.err (!%p2280_p7)
}
  0x12   :  { %32 = dma.hbm_to_vmem [thread:$0]  %s2801_s1, 128, %s30_s13, [#allocation8]  }
  0x13   :  { %s2284_s28 = scalar_lea.hbm %s2800_s0, 4096 }
  0x14   :  { %p2285_p8 = scmp.ne.s32.totalorder %s2800_s0, %s2284_s28  ;;  %p2288_p9 = scmp.lt.u32.totalorder %s2284_s28, %s2800_s0 }
  0x16   :  { %p2290_p10 = pnand %p2288_p9, %p2285_p8 }
  0x18   :  { %2293 = shalt.err (!%p2290_p10)
}
  0x19   :  { %s2294_s6 = scalar_lea.vmem %s2385_s15, 4096  ;;  %p2299_p12 = scmp.lt.s32.totalorder %s2385_s15, %s2385_s15 }
  0x1a   :  { %p2295_p11 = scmp.ne.s32.totalorder %s2385_s15, %s2294_s6  ;;  %p2300_p13 = scmp.lt.s32.totalorder %s2294_s6, %s2294_s6 }
  0x1c   :  { %p2301_p0 = por %p2300_p13, %p2299_p12 }
  0x1e   :  { %p2302_p1 = pnand %p2301_p0, %p2295_p11 }
  0x20   :  { %2305 = shalt.err (!%p2302_p1)
}
  0x21   :  { %s2358_s1 = smov 512   ;;  %s2359_s7 = smov 32  }
  0x22   :  { %22 = dma.hbm_to_vmem [thread:$0]  %s2800_s0, 4096, %s2385_s15, [#allocation5], %s2358_s1, %s2358_s1, %s2359_s7  }
  0x23   :  { %s2360_s10 = smov [#allocation9]   ;;  %s2306_s14 = scalar_lea.hbm %s2802_s2, 8192 }
  0x24   :  { %s38_s11 = sshll.u32 %s2360_s10, 4  ;;  %p2307_p2 = scmp.ne.s32.totalorder %s2802_s2, %s2306_s14  ;;  %s39_s11 = int_to_ptr.vmem [resolvable:$true] %s38_s11 }
  0x25   :  { %p2310_p3 = scmp.lt.u32.totalorder %s2306_s14, %s2802_s2 }
  0x27   :  { %p2312_p4 = pnand %p2310_p3, %p2307_p2 }
  0x29   :  { %2315 = shalt.err (!%p2312_p4)
}
  0x2a   :  { %s2316_s20 = scalar_lea.vmem %s39_s11, 8192  ;;  %p2321_p6 = scmp.lt.s32.totalorder %s39_s11, %s39_s11 }
  0x2b   :  { %p2317_p5 = scmp.ne.s32.totalorder %s39_s11, %s2316_s20  ;;  %p2322_p7 = scmp.lt.s32.totalorder %s2316_s20, %s2316_s20 }
  0x2d   :  { %p2323_p8 = por %p2322_p7, %p2321_p6 }
  0x2f   :  { %p2324_p9 = pnand %p2323_p8, %p2317_p5 }
  0x31   :  { %2327 = shalt.err (!%p2324_p9)
}
  0x32   :  { %44 = dma.hbm_to_vmem [thread:$0]  %s2802_s2, 8192, %s39_s11, [#allocation8], %s2358_s1, %s2358_s1, %s2359_s7  }
  0x33   :  { %2350 = dma.done.wait [#allocation5], 4096  }
  0x34   :  { %2351 = vsyncadd [#allocation5], 4294963200 }
  0x35   :  { %2352 = dma.done.wait [#allocation8], 8320  }
  0x36   :  { %2353 = vsyncadd [#allocation8], 4294958976  ;;  %v2361_v0 = vmov 0.0   ;;  %v62_v1 = vld [vmem:[#allocation9 + $0x8] sm:$0xff]  ;;  %v61_v3 = vld [vmem:[#allocation9] sm:$0xff]  ;;  %s2362_s2 = smov [#allocation10]  }
  0x37   :  { %195 = vmatprep.mubr.f32.mxu0 %v2361_v0  ;;  %266 = vmatprep.mubr.f32.mxu1 %v2361_v0  ;;  %v66_v2 = vld [vmem:[#allocation9 + $0x28] sm:$0xff]  ;;  %v65_v5 = vld [vmem:[#allocation9 + $0x20] sm:$0xff]  ;;  %v64_v19 = vld [vmem:[#allocation9 + $0x18] sm:$0xff]  ;;  %s1576_s21 = sshll.u32 %s2362_s2, 4  ;;  %s1577_s21 = int_to_ptr.vmem [resolvable:$true] %s1576_s21 }
  0x38   :  { %v2430_v4 = vpack.c.bf16 %v66_v2, %v62_v1  ;;  %v70_v6 = vld [vmem:[#allocation9 + $0x48] sm:$0xff]  ;;  %v2432_v8 = vpack.c.bf16 %v65_v5, %v61_v3  ;;  %v69_v10 = vld [vmem:[#allocation9 + $0x40] sm:$0xff]  ;;  %v68_v20 = vld [vmem:[#allocation9 + $0x38] sm:$0xff]  ;;  %s2328_s22 = scalar_lea.vmem %s1577_s21, 1024  ;;  %p2333_p11 = scmp.lt.s32.totalorder %s1577_s21, %s1577_s21 }
  0x39   :  { %v74_v7 = vld [vmem:[#allocation9 + $0x68] sm:$0xff]  ;;  %v73_v11 = vld [vmem:[#allocation9 + $0x60] sm:$0xff]  ;;  %v2443_v22 = vpack.c.bf16 %v68_v20, %v64_v19  ;;  %v63_v23 = vld [vmem:[#allocation9 + $0x10] sm:$0xff]  ;;  %p2329_p10 = scmp.ne.s32.totalorder %s1577_s21, %s2328_s22  ;;  %p2334_p12 = scmp.lt.s32.totalorder %s2328_s22, %s2328_s22 }
  0x3a   :  { %v2434_v9 = vpack.c.bf16 %v74_v7, %v70_v6  ;;  %v78_v12 = vld [vmem:[#allocation9 + $0x88] sm:$0xff]  ;;  %1614 = vmatprep.subr.bf16.mxu0 %v2430_v4  ;;  %v2438_v14 = vpack.c.bf16 %v73_v11, %v69_v10  ;;  %v77_v15 = vld [vmem:[#allocation9 + $0x80] sm:$0xff]  ;;  %v67_v24 = vld [vmem:[#allocation9 + $0x30] sm:$0xff] }
  0x3b   :  { %v82_v13 = vld [vmem:[#allocation9 + $0xa8] sm:$0xff]  ;;  %1616 = vmatpush1.bf16.msra.mxu0 %v2432_v8  ;;  %v81_v16 = vld [vmem:[#allocation9 + $0xa0] sm:$0xff]  ;;  %v2445_v25 = vpack.c.bf16 %v67_v24, %v63_v23  ;;  %1646 = vmatprep.subr.bf16.mxu1 %v2443_v22  ;;  %v72_v27 = vld [vmem:[#allocation9 + $0x58] sm:$0xff]  ;;  %p2335_p13 = por %p2334_p12, %p2333_p11 }
  0x3c   :  { %1618 = vmatprep.subr.bf16.mxu0 %v2434_v9  ;;  %v2441_v17 = vpack.c.bf16 %v82_v13, %v78_v12  ;;  %v86_v18 = vld [vmem:[#allocation9 + $0xc8] sm:$0xff]  ;;  %v2448_v26 = vpack.c.bf16 %v81_v16, %v77_v15  ;;  %v76_v28 = vld [vmem:[#allocation9 + $0x78] sm:$0xff]  ;;  %v71_v29 = vld [vmem:[#allocation9 + $0x50] sm:$0xff] }
  0x3d   :  { %v90_v21 = vld [vmem:[#allocation9 + $0xe8] sm:$0xff]  ;;  %v85_v31 = vld [vmem:[#allocation9 + $0xc0] sm:$0xff]  ;;  %1648 = vmatpush1.bf16.msra.mxu1 %v2445_v25  ;;  %v2455_v33 = vpack.c.bf16 %v76_v28, %v72_v27  ;;  %v75_v34 = vld [vmem:[#allocation9 + $0x70] sm:$0xff]  ;;  %p2336_p0 = pnand %p2335_p13, %p2329_p10 }
  0x3e   :  { %v2452_v30 = vpack.c.bf16 %v90_v21, %v86_v18  ;;  %v89_v32 = vld [vmem:[#allocation9 + $0xe0] sm:$0xff]  ;;  %v94_v35 = vld [vmem:[#allocation9 + $0x108] sm:$0xff]  ;;  %v2457_v37 = vpack.c.bf16 %v75_v34, %v71_v29  ;;  %v80_v38 = vld [vmem:[#allocation9 + $0x98] sm:$0xff] }
  0x3f   :  { %1620 = vmatpush1.bf16.msra.mxu0 %v2438_v14  ;;  %v98_v36 = vld [vmem:[#allocation9 + $0x128] sm:$0xff]  ;;  %1650 = vmatprep.subr.bf16.mxu1 %v2455_v33  ;;  %v84_v39 = vld [vmem:[#allocation9 + $0xb8] sm:$0xff]  ;;  %v79_v40 = vld [vmem:[#allocation9 + $0x90] sm:$0xff]  ;;  %v2461_v42 = vpack.c.bf16 %v89_v32, %v85_v31 }
  0x40   :  { %1622 = vmatprep.subr.bf16.mxu0 %v2441_v17  ;;  %v83_v41 = vld [vmem:[#allocation9 + $0xb0] sm:$0xff]  ;;  %v93_v43 = vld [vmem:[#allocation9 + $0x100] sm:$0xff]  ;;  %v2463_v45 = vpack.c.bf16 %v84_v39, %v80_v38  ;;  %v2466_v46 = vpack.c.bf16 %v98_v36, %v94_v35  ;;  %v102_v47 = vld [vmem:[#allocation9 + $0x148] sm:$0xff] }
  0x41   :  { %v97_v44 = vld [vmem:[#allocation9 + $0x120] sm:$0xff]  ;;  %1652 = vmatpush1.bf16.msra.mxu1 %v2457_v37  ;;  %v2469_v48 = vpack.c.bf16 %v83_v41, %v79_v40  ;;  %v88_v49 = vld [vmem:[#allocation9 + $0xd8] sm:$0xff]  ;;  %v106_v51 = vld [vmem:[#allocation9 + $0x168] sm:$0xff] }
  0x42   :  { %v92_v50 = vld [vmem:[#allocation9 + $0xf8] sm:$0xff]  ;;  %1654 = vmatprep.subr.bf16.mxu1 %v2463_v45  ;;  %v87_v53 = vld [vmem:[#allocation9 + $0xd0] sm:$0xff]  ;;  %v2475_v55 = vpack.c.bf16 %v97_v44, %v93_v43  ;;  %v2478_v58 = vpack.c.bf16 %v106_v51, %v102_v47  ;;  %v101_v59 = vld [vmem:[#allocation9 + $0x140] sm:$0xff] }
  0x43   :  { %1624 = vmatpush1.bf16.msra.mxu0 %v2448_v26  ;;  %v2472_v52 = vpack.c.bf16 %v92_v50, %v88_v49  ;;  %v91_v54 = vld [vmem:[#allocation9 + $0xf0] sm:$0xff]  ;;  %v96_v56 = vld [vmem:[#allocation9 + $0x118] sm:$0xff]  ;;  %v105_v60 = vld [vmem:[#allocation9 + $0x160] sm:$0xff] }
  0x44   :  { %1626 = vmatprep.subr.bf16.mxu0 %v2452_v30  ;;  %v100_v57 = vld [vmem:[#allocation9 + $0x138] sm:$0xff]  ;;  %v110_v61 = vld [vmem:[#allocation9 + $0x188] sm:$0xff]  ;;  %v2481_v62 = vpack.c.bf16 %v91_v54, %v87_v53  ;;  %v95_v2 = vld [vmem:[#allocation9 + $0x110] sm:$0xff]  ;;  %v2487_v7 = vpack.c.bf16 %v105_v60, %v101_v59 }
  0x45   :  { %1656 = vmatpush1.bf16.msra.mxu1 %v2469_v48  ;;  %v114_v63 = vld [vmem:[#allocation9 + $0x1a8] sm:$0xff]  ;;  %v2484_v1 = vpack.c.bf16 %v100_v57, %v96_v56  ;;  %v99_v3 = vld [vmem:[#allocation9 + $0x130] sm:$0xff]  ;;  %v104_v5 = vld [vmem:[#allocation9 + $0x158] sm:$0xff] }
  0x46   :  { %1658 = vmatprep.subr.bf16.mxu1 %v2472_v52  ;;  %v108_v6 = vld [vmem:[#allocation9 + $0x178] sm:$0xff]  ;;  %v2490_v10 = vpack.c.bf16 %v114_v63, %v110_v61  ;;  %v109_v11 = vld [vmem:[#allocation9 + $0x180] sm:$0xff]  ;;  %v118_v13 = vld [vmem:[#allocation9 + $0x1c8] sm:$0xff]  ;;  %v2493_v15 = vpack.c.bf16 %v99_v3, %v95_v2 }
  0x47   :  { %1628 = vmatpush1.bf16.msra.mxu0 %v2461_v42  ;;  %v113_v12 = vld [vmem:[#allocation9 + $0x1a0] sm:$0xff]  ;;  %v122_v16 = vld [vmem:[#allocation9 + $0x1e8] sm:$0xff]  ;;  %v2496_v18 = vpack.c.bf16 %v108_v6, %v104_v5  ;;  %v103_v19 = vld [vmem:[#allocation9 + $0x150] sm:$0xff] }
  0x48   :  { %1630 = vmatprep.subr.bf16.mxu0 %v2466_v46  ;;  %v107_v20 = vld [vmem:[#allocation9 + $0x170] sm:$0xff]  ;;  %v112_v21 = vld [vmem:[#allocation9 + $0x198] sm:$0xff]  ;;  %v2499_v24 = vpack.c.bf16 %v113_v12, %v109_v11  ;;  %v2502_v27 = vpack.c.bf16 %v122_v16, %v118_v13  ;;  %v117_v28 = vld [vmem:[#allocation9 + $0x1c0] sm:$0xff] }
  0x49   :  { %1660 = vmatpush1.bf16.msra.mxu1 %v2481_v62  ;;  %v116_v23 = vld [vmem:[#allocation9 + $0x1b8] sm:$0xff]  ;;  %v121_v29 = vld [vmem:[#allocation9 + $0x1e0] sm:$0xff]  ;;  %v2505_v31 = vpack.c.bf16 %v107_v20, %v103_v19  ;;  %v111_v34 = vld [vmem:[#allocation9 + $0x190] sm:$0xff] }
  0x4a   :  { %1662 = vmatprep.subr.bf16.mxu1 %v2484_v1  ;;  %v2508_v32 = vpack.c.bf16 %v116_v23, %v112_v21  ;;  %v115_v35 = vld [vmem:[#allocation9 + $0x1b0] sm:$0xff]  ;;  %v120_v36 = vld [vmem:[#allocation9 + $0x1d8] sm:$0xff]  ;;  %v2511_v39 = vpack.c.bf16 %v121_v29, %v117_v28  ;;  %v128_v51 = vld [vmem:[#allocation4 + $0x8] sm:$0xff] }
  0x4b   :  { %1632 = vmatpush1.bf16.msra.mxu0 %v2475_v55  ;;  %v124_v38 = vld [vmem:[#allocation9 + $0x1f8] sm:$0xff]  ;;  %v2515_v40 = vpack.c.bf16 %v115_v35, %v111_v34  ;;  %v119_v43 = vld [vmem:[#allocation9 + $0x1d0] sm:$0xff]  ;;  %v129_v61 = vld [vmem:[#allocation4 + $0x10] sm:$0xff] }
  0x4c   :  { %1634 = vmatprep.subr.bf16.mxu0 %v2478_v58  ;;  %v2518_v41 = vpack.c.bf16 %v124_v38, %v120_v36  ;;  %v123_v44 = vld [vmem:[#allocation9 + $0x1f0] sm:$0xff]  ;;  %v58_v47 = vld [vmem:[#allocation7] sm:$0xff] }
  0x4d   :  { %1664 = vmatpush1.bf16.msra.mxu1 %v2493_v15  ;;  %v2522_v49 = vpack.c.bf16 %v123_v44, %v119_v43  ;;  %v127_v50 = vld [vmem:[#allocation4] sm:$0xff]  ;;  %v130_v5 = vld [vmem:[#allocation4 + $0x18] sm:$0xff] }
  0x4e   :  { %1666 = vmatprep.subr.bf16.mxu1 %v2496_v18 }
  0x4f   :  { %1636 = vmatpush1.bf16.msra.mxu0 %v2487_v7 }
  0x50   :  { %1638 = vmatprep.subr.bf16.mxu0 %v2490_v10 }
  0x51   :  { %1668 = vmatpush1.bf16.msra.mxu1 %v2505_v31 }
  0x52   :  { %1670 = vmatprep.subr.bf16.mxu1 %v2508_v32 }
  0x53   :  { %1640 = vmatpush1.bf16.msra.mxu0 %v2499_v24 }
  0x54   :  { %1642 = vmatprep.subr.bf16.mxu0 %v2502_v27 }
  0x55   :  { %1672 = vmatpush1.bf16.msra.mxu1 %v2515_v40 }
  0x56   :  { %1674 = vmatprep.subr.bf16.mxu1 %v2518_v41 }
  0x57   :  { %1644 = vmatpush1.bf16.msra.mxu0 %v2511_v39 }
  0x58   :  { %1678 = vmatprep.subr.bf16.mxu0 %v2430_v4 }
  0x59   :  { %1676 = vmatpush1.bf16.msra.mxu1 %v2522_v49 }
  0x5a   :  { %196 = vmatmul.mubr.f32.vlgmr.msra.gmra.mrb[0].mxu0 %v58_v47  ;;  %1710 = vmatprep.subr.bf16.mxu1 %v2443_v22 }
  0x5b   :  { %1680 = vmatpush1.bf16.msra.mxu0 %v2432_v8  ;;  %375 = vmatprep.mubr.f32.mxu0 %v2361_v0 }
  0x5c   :  { %1682 = vmatprep.subr.bf16.mxu0 %v2434_v9  ;;  %267 = vmatmul.mubr.f32.vlgmr.msra.gmra.mrb[0].mxu1 %v58_v47  ;;  %v307_v47 = vld [vmem:[#allocation4 + $0x20] sm:$0xff] }
  0x5d   :  { %1712 = vmatpush1.bf16.msra.mxu1 %v2445_v25  ;;  %446 = vmatprep.mubr.f32.mxu1 %v2361_v0 }
  0x5e   :  { %1714 = vmatprep.subr.bf16.mxu1 %v2455_v33 }
  0x5f   :  { %1684 = vmatpush1.bf16.msra.mxu0 %v2438_v14 }
  0x60   :  { %1686 = vmatprep.subr.bf16.mxu0 %v2441_v17 }
  0x61   :  { %1716 = vmatpush1.bf16.msra.mxu1 %v2457_v37 }
  0x62   :  { %1718 = vmatprep.subr.bf16.mxu1 %v2463_v45 }
  0x63   :  { %1688 = vmatpush1.bf16.msra.mxu0 %v2448_v26 }
  0x64   :  { %1690 = vmatprep.subr.bf16.mxu0 %v2452_v30 }
  0x65   :  { %1720 = vmatpush1.bf16.msra.mxu1 %v2469_v48 }
  0x66   :  { %1722 = vmatprep.subr.bf16.mxu1 %v2472_v52 }
  0x67   :  { %1692 = vmatpush1.bf16.msra.mxu0 %v2461_v42 }
  0x68   :  { %1694 = vmatprep.subr.bf16.mxu0 %v2466_v46 }
  0x69   :  { %1724 = vmatpush1.bf16.msra.mxu1 %v2481_v62 }
  0x6a   :  { %1726 = vmatprep.subr.bf16.mxu1 %v2484_v1 }
  0x6b   :  { %1696 = vmatpush1.bf16.msra.mxu0 %v2475_v55 }
  0x6c   :  { %1698 = vmatprep.subr.bf16.mxu0 %v2478_v58 }
  0x6d   :  { %1728 = vmatpush1.bf16.msra.mxu1 %v2493_v15 }
  0x6e   :  { %1730 = vmatprep.subr.bf16.mxu1 %v2496_v18 }
  0x6f   :  { %1700 = vmatpush1.bf16.msra.mxu0 %v2487_v7 }
  0x70   :  { %1702 = vmatprep.subr.bf16.mxu0 %v2490_v10 }
  0x71   :  { %1732 = vmatpush1.bf16.msra.mxu1 %v2505_v31 }
  0x72   :  { %1734 = vmatprep.subr.bf16.mxu1 %v2508_v32 }
  0x73   :  { %1704 = vmatpush1.bf16.msra.mxu0 %v2499_v24 }
  0x74   :  { %1706 = vmatprep.subr.bf16.mxu0 %v2502_v27 }
  0x75   :  { %1736 = vmatpush1.bf16.msra.mxu1 %v2515_v40 }
  0x76   :  { %1738 = vmatprep.subr.bf16.mxu1 %v2518_v41 }
  0x77   :  { %1708 = vmatpush1.bf16.msra.mxu0 %v2511_v39 }
  0x78   :  { %1742 = vmatprep.subr.bf16.mxu0 %v2430_v4 }
  0x79   :  { %1740 = vmatpush1.bf16.msra.mxu1 %v2522_v49 }
  0x7a   :  { %1774 = vmatprep.subr.bf16.mxu1 %v2443_v22 }
 0x12d   :  { %v197_v53 = vpop.f32.mrb[0].mxu0 }
 0x12e   :  { %v273_v54 = vadd.f32 %v197_v53, %v127_v50  ;;  %v199_v56 = vpop.f32.mrb[1].mxu0  ;;  %v308_v50 = vld [vmem:[#allocation4 + $0x28] sm:$0xff] }
 0x12f   :  { %v274_v57 = vadd.f32 %v199_v56, %v128_v51  ;;  %v268_v63 = vpop.f32.mrb[0].mxu1 }
 0x130   :  { %v1589_v59 = vmul.f32 -1.442695, %v273_v54  ;;  %v270_v2 = vpop.f32.mrb[1].mxu1  ;;  %v275_v3 = vadd.f32 %v268_v63, %v129_v61  ;;  %v309_v63 = vld [vmem:[#allocation4 + $0x30] sm:$0xff] }
 0x131   :  { %v1590_v60 = vmul.f32 -1.442695, %v274_v57  ;;  %v276_v11 = vadd.f32 %v270_v2, %v130_v5 }
 0x132   :  { %2134 = vpow2.f32 %v1589_v59  ;;  %v1591_v6 = vmul.f32 -1.442695, %v275_v3  ;;  %v310_v3 = vld [vmem:[#allocation4 + $0x38] sm:$0xff] }
 0x133   :  { %2136 = vpow2.f32 %v1590_v60 }
 0x134   :  { %2138 = vpow2.f32 %v1591_v6 }
 0x135   :  { %2140 = vtanh.f32 %v276_v11 }
 0x13c   :  { %v2135_v12 = vpop.eup %2134 }
 0x13d   :  { %v2137_v13 = vpop.eup %2136  ;;  %v280_v16 = vadd.f32 1.0, %v2135_v12 }
 0x13e   :  { %v286_v19 = vadd.f32 1.0, %v2137_v13  ;;  %v2139_v20 = vpop.eup %2138 }
 0x13f   :  { %2142 = vrcp.f32 %v280_v16  ;;  %v2141_v21 = vpop.eup %2140  ;;  %v292_v28 = vadd.f32 1.0, %v2139_v20 }
 0x140   :  { %2144 = vrcp.f32 %v286_v19 }
 0x141   :  { %2146 = vrcp.f32 %v292_v28 }
 0x149   :  { %v2143_v23 = vpop.eup %2142 }
 0x14a   :  { %v2145_v29 = vpop.eup %2144  ;;  %v297_v34 = vmul.f32 %v2143_v23, %v2141_v21 }
 0x14b   :  { %v296_v35 = vmul.f32 0.0, %v2145_v29  ;;  %v2147_v38 = vpop.eup %2146 }
 0x14d   :  { %v2562_v36 = vadd.f32 %v297_v34, %v296_v35 }
 0x14f   :  { %2148 = vtanh.f32 %v2562_v36 }
 0x159   :  { %v2149_v43 = vpop.eup %2148 }
 0x15a   :  { %v300_v44 = vmul.f32 %v2149_v43, %v2147_v38 }
 0x15c   :  { %303 = vst [vmem:[#allocation10] sm:$0xff] %v300_v44  ;;  %376 = vmatmul.mubr.f32.vlgmr.msra.gmra.mrb[2].mxu0 %v300_v44  ;;  %447 = vmatmul.mubr.f32.vlgmr.msra.gmra.mrb[2].mxu1 %v300_v44 }
 0x15d   :  { %1744 = vmatpush1.bf16.msra.mxu0 %v2432_v8  ;;  %1776 = vmatpush1.bf16.msra.mxu1 %v2445_v25 }
 0x15e   :  { %1746 = vmatprep.subr.bf16.mxu0 %v2434_v9  ;;  %1778 = vmatprep.subr.bf16.mxu1 %v2455_v33 }
 0x15f   :  { %556 = vmatprep.mubr.f32.mxu0 %v2361_v0  ;;  %627 = vmatprep.mubr.f32.mxu1 %v2361_v0 }
 0x161   :  { %1748 = vmatpush1.bf16.msra.mxu0 %v2438_v14  ;;  %1780 = vmatpush1.bf16.msra.mxu1 %v2457_v37 }
 0x162   :  { %1750 = vmatprep.subr.bf16.mxu0 %v2441_v17  ;;  %1782 = vmatprep.subr.bf16.mxu1 %v2463_v45 }
 0x165   :  { %1752 = vmatpush1.bf16.msra.mxu0 %v2448_v26  ;;  %1784 = vmatpush1.bf16.msra.mxu1 %v2469_v48 }
 0x166   :  { %1754 = vmatprep.subr.bf16.mxu0 %v2452_v30  ;;  %1786 = vmatprep.subr.bf16.mxu1 %v2472_v52 }
 0x169   :  { %1756 = vmatpush1.bf16.msra.mxu0 %v2461_v42  ;;  %1788 = vmatpush1.bf16.msra.mxu1 %v2481_v62 }
 0x16a   :  { %1758 = vmatprep.subr.bf16.mxu0 %v2466_v46  ;;  %1790 = vmatprep.subr.bf16.mxu1 %v2484_v1 }
 0x16d   :  { %1760 = vmatpush1.bf16.msra.mxu0 %v2475_v55  ;;  %1792 = vmatpush1.bf16.msra.mxu1 %v2493_v15 }
 0x16e   :  { %1762 = vmatprep.subr.bf16.mxu0 %v2478_v58  ;;  %1794 = vmatprep.subr.bf16.mxu1 %v2496_v18 }
 0x171   :  { %1764 = vmatpush1.bf16.msra.mxu0 %v2487_v7  ;;  %1796 = vmatpush1.bf16.msra.mxu1 %v2505_v31 }
 0x172   :  { %1766 = vmatprep.subr.bf16.mxu0 %v2490_v10  ;;  %1798 = vmatprep.subr.bf16.mxu1 %v2508_v32 }
 0x175   :  { %1768 = vmatpush1.bf16.msra.mxu0 %v2499_v24  ;;  %1800 = vmatpush1.bf16.msra.mxu1 %v2515_v40 }
 0x176   :  { %1770 = vmatprep.subr.bf16.mxu0 %v2502_v27  ;;  %1802 = vmatprep.subr.bf16.mxu1 %v2518_v41 }
 0x179   :  { %1772 = vmatpush1.bf16.msra.mxu0 %v2511_v39  ;;  %1804 = vmatpush1.bf16.msra.mxu1 %v2522_v49 }
 0x17a   :  { %1806 = vmatprep.subr.bf16.mxu0 %v2430_v4  ;;  %1838 = vmatprep.subr.bf16.mxu1 %v2443_v22 }
 0x22f   :  { %v377_v51 = vpop.f32.mrb[2].mxu0  ;;  %v448_v53 = vpop.f32.mrb[2].mxu1 }
 0x230   :  { %v453_v54 = vadd.f32 %v377_v51, %v307_v47  ;;  %v379_v56 = vpop.f32.mrb[3].mxu0  ;;  %v450_v57 = vpop.f32.mrb[3].mxu1  ;;  %v455_v2 = vadd.f32 %v448_v53, %v309_v63  ;;  %v489_v47 = vld [vmem:[#allocation4 + $0x48] sm:$0xff] }
 0x231   :  { %v454_v59 = vadd.f32 %v379_v56, %v308_v50  ;;  %v456_v5 = vadd.f32 %v450_v57, %v310_v3 }
 0x232   :  { %v1592_v60 = vmul.f32 -1.442695, %v453_v54  ;;  %v1594_v6 = vmul.f32 -1.442695, %v455_v2  ;;  %v491_v2 = vld [vmem:[#allocation4 + $0x58] sm:$0xff] }
 0x233   :  { %v1593_v61 = vmul.f32 -1.442695, %v454_v59 }
 0x234   :  { %2150 = vpow2.f32 %v1592_v60 }
 0x235   :  { %2152 = vpow2.f32 %v1593_v61  ;;  %v490_v61 = vld [vmem:[#allocation4 + $0x50] sm:$0xff] }
 0x236   :  { %2154 = vtanh.f32 %v456_v5 }
 0x237   :  { %2156 = vpow2.f32 %v1594_v6 }
 0x23e   :  { %v2151_v11 = vpop.eup %2150 }
 0x23f   :  { %v460_v12 = vadd.f32 1.0, %v2151_v11  ;;  %v2153_v13 = vpop.eup %2152 }
 0x240   :  { %v466_v16 = vadd.f32 1.0, %v2153_v13  ;;  %v2155_v19 = vpop.eup %2154 }
 0x241   :  { %2158 = vrcp.f32 %v460_v12  ;;  %v2157_v20 = vpop.eup %2156 }
 0x242   :  { %2160 = vrcp.f32 %v466_v16  ;;  %v472_v29 = vadd.f32 1.0, %v2157_v20 }
 0x244   :  { %2162 = vrcp.f32 %v472_v29 }
 0x24b   :  { %v2159_v21 = vpop.eup %2158 }
 0x24c   :  { %v477_v23 = vmul.f32 %v2159_v21, %v2155_v19  ;;  %v2161_v28 = vpop.eup %2160 }
 0x24d   :  { %v476_v34 = vmul.f32 %v2161_v28, %v2562_v36  ;;  %v488_v36 = vld [vmem:[#allocation4 + $0x40] sm:$0xff] }
 0x24e   :  { %v2163_v38 = vpop.eup %2162 }
 0x24f   :  { %v2600_v35 = vadd.f32 %v477_v23, %v476_v34 }
 0x251   :  { %2164 = vtanh.f32 %v2600_v35 }
 0x25b   :  { %v2165_v43 = vpop.eup %2164 }
 0x25c   :  { %v480_v44 = vmul.f32 %v2165_v43, %v2163_v38 }
 0x25e   :  { %484 = vst [vmem:[#allocation10 + $0x8] sm:$0xff] %v480_v44  ;;  %557 = vmatmul.mubr.f32.vlgmr.msra.gmra.mrb[4].mxu0 %v480_v44  ;;  %628 = vmatmul.mubr.f32.vlgmr.msra.gmra.mrb[4].mxu1 %v480_v44 }
 0x25f   :  { %1808 = vmatpush1.bf16.msra.mxu0 %v2432_v8  ;;  %1840 = vmatpush1.bf16.msra.mxu1 %v2445_v25 }
 0x260   :  { %1810 = vmatprep.subr.bf16.mxu0 %v2434_v9  ;;  %1842 = vmatprep.subr.bf16.mxu1 %v2455_v33 }
 0x261   :  { %737 = vmatprep.mubr.f32.mxu0 %v2361_v0  ;;  %808 = vmatprep.mubr.f32.mxu1 %v2361_v0 }
 0x263   :  { %1812 = vmatpush1.bf16.msra.mxu0 %v2438_v14  ;;  %1844 = vmatpush1.bf16.msra.mxu1 %v2457_v37 }
 0x264   :  { %1814 = vmatprep.subr.bf16.mxu0 %v2441_v17  ;;  %1846 = vmatprep.subr.bf16.mxu1 %v2463_v45 }
 0x267   :  { %1816 = vmatpush1.bf16.msra.mxu0 %v2448_v26  ;;  %1848 = vmatpush1.bf16.msra.mxu1 %v2469_v48 }
 0x268   :  { %1818 = vmatprep.subr.bf16.mxu0 %v2452_v30  ;;  %1850 = vmatprep.subr.bf16.mxu1 %v2472_v52 }
 0x26b   :  { %1820 = vmatpush1.bf16.msra.mxu0 %v2461_v42  ;;  %1852 = vmatpush1.bf16.msra.mxu1 %v2481_v62 }
 0x26c   :  { %1822 = vmatprep.subr.bf16.mxu0 %v2466_v46  ;;  %1854 = vmatprep.subr.bf16.mxu1 %v2484_v1 }
 0x26f   :  { %1824 = vmatpush1.bf16.msra.mxu0 %v2475_v55  ;;  %1856 = vmatpush1.bf16.msra.mxu1 %v2493_v15 }
 0x270   :  { %1826 = vmatprep.subr.bf16.mxu0 %v2478_v58  ;;  %1858 = vmatprep.subr.bf16.mxu1 %v2496_v18 }
 0x273   :  { %1828 = vmatpush1.bf16.msra.mxu0 %v2487_v7  ;;  %1860 = vmatpush1.bf16.msra.mxu1 %v2505_v31 }
 0x274   :  { %1830 = vmatprep.subr.bf16.mxu0 %v2490_v10  ;;  %1862 = vmatprep.subr.bf16.mxu1 %v2508_v32 }
 0x277   :  { %1832 = vmatpush1.bf16.msra.mxu0 %v2499_v24  ;;  %1864 = vmatpush1.bf16.msra.mxu1 %v2515_v40 }
 0x278   :  { %1834 = vmatprep.subr.bf16.mxu0 %v2502_v27  ;;  %1866 = vmatprep.subr.bf16.mxu1 %v2518_v41 }
 0x27b   :  { %1836 = vmatpush1.bf16.msra.mxu0 %v2511_v39  ;;  %1868 = vmatpush1.bf16.msra.mxu1 %v2522_v49 }
 0x27c   :  { %1870 = vmatprep.subr.bf16.mxu0 %v2430_v4  ;;  %1902 = vmatprep.subr.bf16.mxu1 %v2443_v22 }
 0x331   :  { %v558_v50 = vpop.f32.mrb[4].mxu0  ;;  %v629_v51 = vpop.f32.mrb[4].mxu1 }
 0x332   :  { %v634_v53 = vadd.f32 %v558_v50, %v488_v36  ;;  %v560_v54 = vpop.f32.mrb[5].mxu0  ;;  %v631_v56 = vpop.f32.mrb[5].mxu1  ;;  %v636_v63 = vadd.f32 %v629_v51, %v490_v61  ;;  %v670_v36 = vld [vmem:[#allocation4 + $0x68] sm:$0xff] }
 0x333   :  { %v635_v57 = vadd.f32 %v560_v54, %v489_v47  ;;  %v637_v3 = vadd.f32 %v631_v56, %v491_v2 }
 0x334   :  { %v1595_v59 = vmul.f32 -1.442695, %v634_v53  ;;  %v1597_v5 = vmul.f32 -1.442695, %v636_v63  ;;  %v672_v63 = vld [vmem:[#allocation4 + $0x78] sm:$0xff] }
 0x335   :  { %v1596_v60 = vmul.f32 -1.442695, %v635_v57 }
 0x336   :  { %2166 = vpow2.f32 %v1595_v59 }
 0x337   :  { %2168 = vpow2.f32 %v1596_v60  ;;  %v671_v60 = vld [vmem:[#allocation4 + $0x70] sm:$0xff] }
 0x338   :  { %2170 = vtanh.f32 %v637_v3 }
 0x339   :  { %2172 = vpow2.f32 %v1597_v5 }
 0x340   :  { %v2167_v6 = vpop.eup %2166 }
 0x341   :  { %v641_v11 = vadd.f32 1.0, %v2167_v6  ;;  %v2169_v12 = vpop.eup %2168 }
 0x342   :  { %v647_v13 = vadd.f32 1.0, %v2169_v12  ;;  %v2171_v16 = vpop.eup %2170 }
 0x343   :  { %2174 = vrcp.f32 %v641_v11  ;;  %v2173_v19 = vpop.eup %2172 }
 0x344   :  { %2176 = vrcp.f32 %v647_v13  ;;  %v653_v28 = vadd.f32 1.0, %v2173_v19 }
 0x346   :  { %2178 = vrcp.f32 %v653_v28 }
 0x34d   :  { %v2175_v20 = vpop.eup %2174 }
 0x34e   :  { %v658_v21 = vmul.f32 %v2175_v20, %v2171_v16  ;;  %v2177_v23 = vpop.eup %2176 }
 0x34f   :  { %v657_v29 = vmul.f32 %v2177_v23, %v2600_v35  ;;  %v669_v35 = vld [vmem:[#allocation4 + $0x60] sm:$0xff] }
 0x350   :  { %v2179_v38 = vpop.eup %2178 }
 0x351   :  { %v2638_v34 = vadd.f32 %v658_v21, %v657_v29 }
 0x353   :  { %2180 = vtanh.f32 %v2638_v34 }
 0x35d   :  { %v2181_v43 = vpop.eup %2180 }
 0x35e   :  { %v661_v44 = vmul.f32 %v2181_v43, %v2179_v38 }
 0x360   :  { %665 = vst [vmem:[#allocation10 + $0x10] sm:$0xff] %v661_v44  ;;  %738 = vmatmul.mubr.f32.vlgmr.msra.gmra.mrb[6].mxu0 %v661_v44  ;;  %809 = vmatmul.mubr.f32.vlgmr.msra.gmra.mrb[6].mxu1 %v661_v44 }
 0x361   :  { %1872 = vmatpush1.bf16.msra.mxu0 %v2432_v8  ;;  %1904 = vmatpush1.bf16.msra.mxu1 %v2445_v25 }
 0x362   :  { %1874 = vmatprep.subr.bf16.mxu0 %v2434_v9  ;;  %1906 = vmatprep.subr.bf16.mxu1 %v2455_v33 }
 0x363   :  { %918 = vmatprep.mubr.f32.mxu0 %v2361_v0  ;;  %989 = vmatprep.mubr.f32.mxu1 %v2361_v0 }
 0x365   :  { %1876 = vmatpush1.bf16.msra.mxu0 %v2438_v14  ;;  %1908 = vmatpush1.bf16.msra.mxu1 %v2457_v37 }
 0x366   :  { %1878 = vmatprep.subr.bf16.mxu0 %v2441_v17  ;;  %1910 = vmatprep.subr.bf16.mxu1 %v2463_v45 }
 0x369   :  { %1880 = vmatpush1.bf16.msra.mxu0 %v2448_v26  ;;  %1912 = vmatpush1.bf16.msra.mxu1 %v2469_v48 }
 0x36a   :  { %1882 = vmatprep.subr.bf16.mxu0 %v2452_v30  ;;  %1914 = vmatprep.subr.bf16.mxu1 %v2472_v52 }
 0x36d   :  { %1884 = vmatpush1.bf16.msra.mxu0 %v2461_v42  ;;  %1916 = vmatpush1.bf16.msra.mxu1 %v2481_v62 }
 0x36e   :  { %1886 = vmatprep.subr.bf16.mxu0 %v2466_v46  ;;  %1918 = vmatprep.subr.bf16.mxu1 %v2484_v1 }
 0x371   :  { %1888 = vmatpush1.bf16.msra.mxu0 %v2475_v55  ;;  %1920 = vmatpush1.bf16.msra.mxu1 %v2493_v15 }
 0x372   :  { %1890 = vmatprep.subr.bf16.mxu0 %v2478_v58  ;;  %1922 = vmatprep.subr.bf16.mxu1 %v2496_v18 }
 0x375   :  { %1892 = vmatpush1.bf16.msra.mxu0 %v2487_v7  ;;  %1924 = vmatpush1.bf16.msra.mxu1 %v2505_v31 }
 0x376   :  { %1894 = vmatprep.subr.bf16.mxu0 %v2490_v10  ;;  %1926 = vmatprep.subr.bf16.mxu1 %v2508_v32 }
 0x379   :  { %1896 = vmatpush1.bf16.msra.mxu0 %v2499_v24  ;;  %1928 = vmatpush1.bf16.msra.mxu1 %v2515_v40 }
 0x37a   :  { %1898 = vmatprep.subr.bf16.mxu0 %v2502_v27  ;;  %1930 = vmatprep.subr.bf16.mxu1 %v2518_v41 }
 0x37d   :  { %1900 = vmatpush1.bf16.msra.mxu0 %v2511_v39  ;;  %1932 = vmatpush1.bf16.msra.mxu1 %v2522_v49 }
 0x37e   :  { %1934 = vmatprep.subr.bf16.mxu0 %v2430_v4  ;;  %1966 = vmatprep.subr.bf16.mxu1 %v2443_v22 }
 0x433   :  { %v739_v47 = vpop.f32.mrb[6].mxu0  ;;  %v810_v50 = vpop.f32.mrb[6].mxu1 }
 0x434   :  { %v815_v51 = vadd.f32 %v739_v47, %v669_v35  ;;  %v741_v53 = vpop.f32.mrb[7].mxu0  ;;  %v812_v54 = vpop.f32.mrb[7].mxu1  ;;  %v817_v61 = vadd.f32 %v810_v50, %v671_v60  ;;  %v851_v35 = vld [vmem:[#allocation4 + $0x88] sm:$0xff] }
 0x435   :  { %v816_v56 = vadd.f32 %v741_v53, %v670_v36  ;;  %v818_v2 = vadd.f32 %v812_v54, %v672_v63 }
 0x436   :  { %v1598_v57 = vmul.f32 -1.442695, %v815_v51  ;;  %v1600_v3 = vmul.f32 -1.442695, %v817_v61  ;;  %v853_v61 = vld [vmem:[#allocation4 + $0x98] sm:$0xff] }
 0x437   :  { %v1599_v59 = vmul.f32 -1.442695, %v816_v56 }
 0x438   :  { %2182 = vpow2.f32 %v1598_v57 }
 0x439   :  { %2184 = vpow2.f32 %v1599_v59  ;;  %v852_v59 = vld [vmem:[#allocation4 + $0x90] sm:$0xff] }
 0x43a   :  { %2186 = vtanh.f32 %v818_v2 }
 0x43b   :  { %2188 = vpow2.f32 %v1600_v3 }
 0x442   :  { %v2183_v5 = vpop.eup %2182 }
 0x443   :  { %v822_v6 = vadd.f32 1.0, %v2183_v5  ;;  %v2185_v11 = vpop.eup %2184 }
 0x444   :  { %v828_v12 = vadd.f32 1.0, %v2185_v11  ;;  %v2187_v13 = vpop.eup %2186 }
 0x445   :  { %2190 = vrcp.f32 %v822_v6  ;;  %v2189_v16 = vpop.eup %2188 }
 0x446   :  { %2192 = vrcp.f32 %v828_v12  ;;  %v834_v23 = vadd.f32 1.0, %v2189_v16 }
 0x448   :  { %2194 = vrcp.f32 %v834_v23 }
 0x44f   :  { %v2191_v19 = vpop.eup %2190 }
 0x450   :  { %v839_v20 = vmul.f32 %v2191_v19, %v2187_v13  ;;  %v2193_v21 = vpop.eup %2192 }
 0x451   :  { %v838_v28 = vmul.f32 %v2193_v21, %v2638_v34  ;;  %v850_v34 = vld [vmem:[#allocation4 + $0x80] sm:$0xff] }
 0x452   :  { %v2195_v38 = vpop.eup %2194 }
 0x453   :  { %v2676_v29 = vadd.f32 %v839_v20, %v838_v28 }
 0x455   :  { %2196 = vtanh.f32 %v2676_v29 }
 0x45f   :  { %v2197_v43 = vpop.eup %2196 }
 0x460   :  { %v842_v44 = vmul.f32 %v2197_v43, %v2195_v38 }
 0x462   :  { %846 = vst [vmem:[#allocation10 + $0x18] sm:$0xff] %v842_v44  ;;  %919 = vmatmul.mubr.f32.vlgmr.msra.gmra.mrb[8].mxu0 %v842_v44  ;;  %990 = vmatmul.mubr.f32.vlgmr.msra.gmra.mrb[8].mxu1 %v842_v44 }
 0x463   :  { %1936 = vmatpush1.bf16.msra.mxu0 %v2432_v8  ;;  %1968 = vmatpush1.bf16.msra.mxu1 %v2445_v25 }
 0x464   :  { %1938 = vmatprep.subr.bf16.mxu0 %v2434_v9  ;;  %1970 = vmatprep.subr.bf16.mxu1 %v2455_v33 }
 0x465   :  { %1099 = vmatprep.mubr.f32.mxu0 %v2361_v0  ;;  %1170 = vmatprep.mubr.f32.mxu1 %v2361_v0 }
 0x467   :  { %1940 = vmatpush1.bf16.msra.mxu0 %v2438_v14  ;;  %1972 = vmatpush1.bf16.msra.mxu1 %v2457_v37 }
 0x468   :  { %1942 = vmatprep.subr.bf16.mxu0 %v2441_v17  ;;  %1974 = vmatprep.subr.bf16.mxu1 %v2463_v45 }
 0x46b   :  { %1944 = vmatpush1.bf16.msra.mxu0 %v2448_v26  ;;  %1976 = vmatpush1.bf16.msra.mxu1 %v2469_v48 }
 0x46c   :  { %1946 = vmatprep.subr.bf16.mxu0 %v2452_v30  ;;  %1978 = vmatprep.subr.bf16.mxu1 %v2472_v52 }
 0x46f   :  { %1948 = vmatpush1.bf16.msra.mxu0 %v2461_v42  ;;  %1980 = vmatpush1.bf16.msra.mxu1 %v2481_v62 }
 0x470   :  { %1950 = vmatprep.subr.bf16.mxu0 %v2466_v46  ;;  %1982 = vmatprep.subr.bf16.mxu1 %v2484_v1 }
 0x473   :  { %1952 = vmatpush1.bf16.msra.mxu0 %v2475_v55  ;;  %1984 = vmatpush1.bf16.msra.mxu1 %v2493_v15 }
 0x474   :  { %1954 = vmatprep.subr.bf16.mxu0 %v2478_v58  ;;  %1986 = vmatprep.subr.bf16.mxu1 %v2496_v18 }
 0x477   :  { %1956 = vmatpush1.bf16.msra.mxu0 %v2487_v7  ;;  %1988 = vmatpush1.bf16.msra.mxu1 %v2505_v31 }
 0x478   :  { %1958 = vmatprep.subr.bf16.mxu0 %v2490_v10  ;;  %1990 = vmatprep.subr.bf16.mxu1 %v2508_v32 }
 0x47b   :  { %1960 = vmatpush1.bf16.msra.mxu0 %v2499_v24  ;;  %1992 = vmatpush1.bf16.msra.mxu1 %v2515_v40 }
 0x47c   :  { %1962 = vmatprep.subr.bf16.mxu0 %v2502_v27  ;;  %1994 = vmatprep.subr.bf16.mxu1 %v2518_v41 }
 0x47f   :  { %1964 = vmatpush1.bf16.msra.mxu0 %v2511_v39  ;;  %1996 = vmatpush1.bf16.msra.mxu1 %v2522_v49 }
 0x480   :  { %1998 = vmatprep.subr.bf16.mxu0 %v2430_v4  ;;  %2030 = vmatprep.subr.bf16.mxu1 %v2443_v22 }
 0x535   :  { %v920_v36 = vpop.f32.mrb[8].mxu0  ;;  %v991_v47 = vpop.f32.mrb[8].mxu1 }
 0x536   :  { %v996_v50 = vadd.f32 %v920_v36, %v850_v34  ;;  %v922_v51 = vpop.f32.mrb[9].mxu0  ;;  %v993_v53 = vpop.f32.mrb[9].mxu1  ;;  %v998_v60 = vadd.f32 %v991_v47, %v852_v59  ;;  %v1032_v34 = vld [vmem:[#allocation4 + $0xa8] sm:$0xff] }
 0x537   :  { %v997_v54 = vadd.f32 %v922_v51, %v851_v35  ;;  %v999_v63 = vadd.f32 %v993_v53, %v853_v61 }
 0x538   :  { %v1601_v56 = vmul.f32 -1.442695, %v996_v50  ;;  %v1603_v2 = vmul.f32 -1.442695, %v998_v60  ;;  %v1034_v60 = vld [vmem:[#allocation4 + $0xb8] sm:$0xff] }
 0x539   :  { %v1602_v57 = vmul.f32 -1.442695, %v997_v54 }
 0x53a   :  { %2198 = vpow2.f32 %v1601_v56 }
 0x53b   :  { %2200 = vpow2.f32 %v1602_v57  ;;  %v1033_v57 = vld [vmem:[#allocation4 + $0xb0] sm:$0xff] }
 0x53c   :  { %2202 = vtanh.f32 %v999_v63 }
 0x53d   :  { %2204 = vpow2.f32 %v1603_v2 }
 0x544   :  { %v2199_v3 = vpop.eup %2198 }
 0x545   :  { %v1003_v5 = vadd.f32 1.0, %v2199_v3  ;;  %v2201_v6 = vpop.eup %2200 }
 0x546   :  { %v1009_v11 = vadd.f32 1.0, %v2201_v6  ;;  %v2203_v12 = vpop.eup %2202 }
 0x547   :  { %2206 = vrcp.f32 %v1003_v5  ;;  %v2205_v13 = vpop.eup %2204 }
 0x548   :  { %2208 = vrcp.f32 %v1009_v11  ;;  %v1015_v21 = vadd.f32 1.0, %v2205_v13 }
 0x54a   :  { %2210 = vrcp.f32 %v1015_v21 }
 0x551   :  { %v2207_v16 = vpop.eup %2206 }
 0x552   :  { %v1020_v19 = vmul.f32 %v2207_v16, %v2203_v12  ;;  %v2209_v20 = vpop.eup %2208 }
 0x553   :  { %v1019_v23 = vmul.f32 %v2209_v20, %v2676_v29  ;;  %v1031_v29 = vld [vmem:[#allocation4 + $0xa0] sm:$0xff] }
 0x554   :  { %v2211_v38 = vpop.eup %2210 }
 0x555   :  { %v2714_v28 = vadd.f32 %v1020_v19, %v1019_v23 }
 0x557   :  { %2212 = vtanh.f32 %v2714_v28 }
 0x561   :  { %v2213_v43 = vpop.eup %2212 }
 0x562   :  { %v1023_v44 = vmul.f32 %v2213_v43, %v2211_v38 }
 0x564   :  { %1027 = vst [vmem:[#allocation10 + $0x20] sm:$0xff] %v1023_v44  ;;  %1100 = vmatmul.mubr.f32.vlgmr.msra.gmra.mrb[10].mxu0 %v1023_v44  ;;  %1171 = vmatmul.mubr.f32.vlgmr.msra.gmra.mrb[10].mxu1 %v1023_v44 }
 0x565   :  { %2000 = vmatpush1.bf16.msra.mxu0 %v2432_v8  ;;  %2032 = vmatpush1.bf16.msra.mxu1 %v2445_v25 }
 0x566   :  { %2002 = vmatprep.subr.bf16.mxu0 %v2434_v9  ;;  %2034 = vmatprep.subr.bf16.mxu1 %v2455_v33 }
 0x567   :  { %1280 = vmatprep.mubr.f32.mxu0 %v2361_v0  ;;  %1351 = vmatprep.mubr.f32.mxu1 %v2361_v0 }
 0x569   :  { %2004 = vmatpush1.bf16.msra.mxu0 %v2438_v14  ;;  %2036 = vmatpush1.bf16.msra.mxu1 %v2457_v37 }
 0x56a   :  { %2006 = vmatprep.subr.bf16.mxu0 %v2441_v17  ;;  %2038 = vmatprep.subr.bf16.mxu1 %v2463_v45 }
 0x56d   :  { %2008 = vmatpush1.bf16.msra.mxu0 %v2448_v26  ;;  %2040 = vmatpush1.bf16.msra.mxu1 %v2469_v48 }
 0x56e   :  { %2010 = vmatprep.subr.bf16.mxu0 %v2452_v30  ;;  %2042 = vmatprep.subr.bf16.mxu1 %v2472_v52 }
 0x571   :  { %2012 = vmatpush1.bf16.msra.mxu0 %v2461_v42  ;;  %2044 = vmatpush1.bf16.msra.mxu1 %v2481_v62 }
 0x572   :  { %2014 = vmatprep.subr.bf16.mxu0 %v2466_v46  ;;  %2046 = vmatprep.subr.bf16.mxu1 %v2484_v1 }
 0x575   :  { %2016 = vmatpush1.bf16.msra.mxu0 %v2475_v55  ;;  %2048 = vmatpush1.bf16.msra.mxu1 %v2493_v15 }
 0x576   :  { %2018 = vmatprep.subr.bf16.mxu0 %v2478_v58  ;;  %2050 = vmatprep.subr.bf16.mxu1 %v2496_v18 }
 0x579   :  { %2020 = vmatpush1.bf16.msra.mxu0 %v2487_v7  ;;  %2052 = vmatpush1.bf16.msra.mxu1 %v2505_v31 }
 0x57a   :  { %2022 = vmatprep.subr.bf16.mxu0 %v2490_v10  ;;  %2054 = vmatprep.subr.bf16.mxu1 %v2508_v32 }
 0x57d   :  { %2024 = vmatpush1.bf16.msra.mxu0 %v2499_v24  ;;  %2056 = vmatpush1.bf16.msra.mxu1 %v2515_v40 }
 0x57e   :  { %2026 = vmatprep.subr.bf16.mxu0 %v2502_v27  ;;  %2058 = vmatprep.subr.bf16.mxu1 %v2518_v41 }
 0x581   :  { %2028 = vmatpush1.bf16.msra.mxu0 %v2511_v39  ;;  %2060 = vmatpush1.bf16.msra.mxu1 %v2522_v49 }
 0x582   :  { %2062 = vmatprep.subr.bf16.mxu0 %v2430_v4  ;;  %2094 = vmatprep.subr.bf16.mxu1 %v2443_v22 }
 0x637   :  { %v1101_v35 = vpop.f32.mrb[10].mxu0  ;;  %v1172_v36 = vpop.f32.mrb[10].mxu1 }
 0x638   :  { %v1177_v47 = vadd.f32 %v1101_v35, %v1031_v29  ;;  %v1103_v50 = vpop.f32.mrb[11].mxu0  ;;  %v1174_v51 = vpop.f32.mrb[11].mxu1  ;;  %v1179_v59 = vadd.f32 %v1172_v36, %v1033_v57 }
 0x639   :  { %v1178_v53 = vadd.f32 %v1103_v50, %v1032_v34  ;;  %v1180_v61 = vadd.f32 %v1174_v51, %v1034_v60  ;;  %v1395_v51 = vld [vmem:[#allocation4 + $0xf0] sm:$0xff] }
 0x63a   :  { %v1604_v54 = vmul.f32 -1.442695, %v1177_v47  ;;  %v1606_v63 = vmul.f32 -1.442695, %v1179_v59 }
 0x63b   :  { %v1605_v56 = vmul.f32 -1.442695, %v1178_v53 }
 0x63c   :  { %2214 = vpow2.f32 %v1604_v54  ;;  %v1396_v54 = vld [vmem:[#allocation4 + $0xf8] sm:$0xff] }
 0x63d   :  { %2216 = vpow2.f32 %v1605_v56 }
 0x63e   :  { %2218 = vtanh.f32 %v1180_v61 }
 0x63f   :  { %2220 = vpow2.f32 %v1606_v63 }
 0x646   :  { %v2215_v4 = vpop.eup %2214 }
 0x647   :  { %v1184_v2 = vadd.f32 1.0, %v2215_v4  ;;  %v2217_v22 = vpop.eup %2216 }
 0x648   :  { %v1190_v3 = vadd.f32 1.0, %v2217_v22  ;;  %v2219_v5 = vpop.eup %2218 }
 0x649   :  { %2222 = vrcp.f32 %v1184_v2  ;;  %v2221_v6 = vpop.eup %2220 }
 0x64a   :  { %2224 = vrcp.f32 %v1190_v3  ;;  %v1196_v16 = vadd.f32 1.0, %v2221_v6 }
 0x64c   :  { %2226 = vrcp.f32 %v1196_v16 }
 0x653   :  { %v2223_v11 = vpop.eup %2222 }
 0x654   :  { %v1201_v12 = vmul.f32 %v2223_v11, %v2219_v5  ;;  %v2225_v13 = vpop.eup %2224 }
 0x655   :  { %v1200_v19 = vmul.f32 %v2225_v13, %v2714_v28  ;;  %v1394_v28 = vld [vmem:[#allocation4 + $0xe8] sm:$0xff] }
 0x656   :  { %v2227_v21 = vpop.eup %2226 }
 0x657   :  { %v2752_v20 = vadd.f32 %v1201_v12, %v1200_v19 }
 0x659   :  { %2228 = vtanh.f32 %v2752_v20 }
 0x663   :  { %v2229_v23 = vpop.eup %2228 }
 0x664   :  { %v1204_v38 = vmul.f32 %v2229_v23, %v2227_v21 }
 0x666   :  { %1208 = vst [vmem:[#allocation10 + $0x28] sm:$0xff] %v1204_v38  ;;  %1281 = vmatmul.mubr.f32.vlgmr.msra.gmra.mrb[12].mxu0 %v1204_v38  ;;  %1352 = vmatmul.mubr.f32.vlgmr.msra.gmra.mrb[12].mxu1 %v1204_v38 }
 0x667   :  { %2064 = vmatpush1.bf16.msra.mxu0 %v2432_v8  ;;  %2096 = vmatpush1.bf16.msra.mxu1 %v2445_v25  ;;  %v1213_v8 = vld [vmem:[#allocation4 + $0xc8] sm:$0xff] }
 0x668   :  { %2066 = vmatprep.subr.bf16.mxu0 %v2434_v9  ;;  %2098 = vmatprep.subr.bf16.mxu1 %v2455_v33 }
 0x669   :  { %1461 = vmatprep.mubr.f32.mxu0 %v2361_v0  ;;  %1532 = vmatprep.mubr.f32.mxu1 %v2361_v0  ;;  %v1212_v0 = vld [vmem:[#allocation4 + $0xc0] sm:$0xff] }
 0x66b   :  { %2068 = vmatpush1.bf16.msra.mxu0 %v2438_v14  ;;  %2100 = vmatpush1.bf16.msra.mxu1 %v2457_v37 }
 0x66c   :  { %2070 = vmatprep.subr.bf16.mxu0 %v2441_v17  ;;  %2102 = vmatprep.subr.bf16.mxu1 %v2463_v45 }
 0x66f   :  { %2072 = vmatpush1.bf16.msra.mxu0 %v2448_v26  ;;  %2104 = vmatpush1.bf16.msra.mxu1 %v2469_v48 }
 0x670   :  { %2074 = vmatprep.subr.bf16.mxu0 %v2452_v30  ;;  %2106 = vmatprep.subr.bf16.mxu1 %v2472_v52 }
 0x673   :  { %2076 = vmatpush1.bf16.msra.mxu0 %v2461_v42  ;;  %2108 = vmatpush1.bf16.msra.mxu1 %v2481_v62  ;;  %v1214_v42 = vld [vmem:[#allocation4 + $0xd0] sm:$0xff] }
 0x674   :  { %2078 = vmatprep.subr.bf16.mxu0 %v2466_v46  ;;  %2110 = vmatprep.subr.bf16.mxu1 %v2484_v1  ;;  %v1215_v46 = vld [vmem:[#allocation4 + $0xd8] sm:$0xff] }
 0x677   :  { %2080 = vmatpush1.bf16.msra.mxu0 %v2475_v55  ;;  %2112 = vmatpush1.bf16.msra.mxu1 %v2493_v15 }
 0x678   :  { %2082 = vmatprep.subr.bf16.mxu0 %v2478_v58  ;;  %2114 = vmatprep.subr.bf16.mxu1 %v2496_v18 }
 0x67b   :  { %2084 = vmatpush1.bf16.msra.mxu0 %v2487_v7  ;;  %2116 = vmatpush1.bf16.msra.mxu1 %v2505_v31 }
 0x67c   :  { %2086 = vmatprep.subr.bf16.mxu0 %v2490_v10  ;;  %2118 = vmatprep.subr.bf16.mxu1 %v2508_v32 }
 0x67f   :  { %2088 = vmatpush1.bf16.msra.mxu0 %v2499_v24  ;;  %2120 = vmatpush1.bf16.msra.mxu1 %v2515_v40 }
 0x680   :  { %2090 = vmatprep.subr.bf16.mxu0 %v2502_v27  ;;  %2122 = vmatprep.subr.bf16.mxu1 %v2518_v41 }
 0x683   :  { %2092 = vmatpush1.bf16.msra.mxu0 %v2511_v39  ;;  %2124 = vmatpush1.bf16.msra.mxu1 %v2522_v49  ;;  %v1393_v49 = vld [vmem:[#allocation4 + $0xe0] sm:$0xff] }
 0x739   :  { %v1282_v9 = vpop.f32.mrb[12].mxu0  ;;  %v1353_v14 = vpop.f32.mrb[12].mxu1 }
 0x73a   :  { %v1358_v17 = vadd.f32 %v1282_v9, %v1212_v0  ;;  %v1284_v25 = vpop.f32.mrb[13].mxu0  ;;  %v1355_v26 = vpop.f32.mrb[13].mxu1  ;;  %v1360_v45 = vadd.f32 %v1353_v14, %v1214_v42 }
 0x73b   :  { %v1359_v30 = vadd.f32 %v1284_v25, %v1213_v8  ;;  %v1361_v48 = vadd.f32 %v1355_v26, %v1215_v46 }
 0x73c   :  { %v1607_v33 = vmul.f32 -1.442695, %v1358_v17  ;;  %v1609_v52 = vmul.f32 -1.442695, %v1360_v45 }
 0x73d   :  { %v1608_v37 = vmul.f32 -1.442695, %v1359_v30 }
 0x73e   :  { %2230 = vpow2.f32 %v1607_v33 }
 0x73f   :  { %2232 = vpow2.f32 %v1608_v37 }
 0x740   :  { %2234 = vtanh.f32 %v1361_v48 }
 0x741   :  { %2236 = vpow2.f32 %v1609_v52 }
 0x748   :  { %v2231_v55 = vpop.eup %2230 }
 0x749   :  { %v1365_v58 = vadd.f32 1.0, %v2231_v55  ;;  %v2233_v62 = vpop.eup %2232 }
 0x74a   :  { %v1371_v1 = vadd.f32 1.0, %v2233_v62  ;;  %v2235_v7 = vpop.eup %2234 }
 0x74b   :  { %2238 = vrcp.f32 %v1365_v58  ;;  %v2237_v10 = vpop.eup %2236 }
 0x74c   :  { %2240 = vrcp.f32 %v1371_v1  ;;  %v1377_v27 = vadd.f32 1.0, %v2237_v10 }
 0x74e   :  { %2242 = vrcp.f32 %v1377_v27 }
 0x755   :  { %v2239_v15 = vpop.eup %2238 }
 0x756   :  { %v1382_v18 = vmul.f32 %v2239_v15, %v2235_v7  ;;  %v2241_v24 = vpop.eup %2240 }
 0x757   :  { %v1381_v31 = vmul.f32 %v2241_v24, %v2752_v20 }
 0x758   :  { %v2243_v39 = vpop.eup %2242 }
 0x759   :  { %v1383_v32 = vadd.f32 %v1382_v18, %v1381_v31 }
 0x75b   :  { %2244 = vtanh.f32 %v1383_v32 }
 0x765   :  { %v2245_v40 = vpop.eup %2244 }
 0x766   :  { %v1385_v41 = vmul.f32 %v2245_v40, %v2243_v39 }
 0x768   :  { %1389 = vst [vmem:[#allocation10 + $0x30] sm:$0xff] %v1385_v41  ;;  %1462 = vmatmul.mubr.f32.vlgmr.msra.gmra.mrb[14].mxu0 %v1385_v41  ;;  %1533 = vmatmul.mubr.f32.vlgmr.msra.gmra.mrb[14].mxu1 %v1385_v41 }
 0x83b   :  { %v1463_v43 = vpop.f32.mrb[14].mxu0  ;;  %v1534_v44 = vpop.f32.mrb[14].mxu1 }
 0x83c   :  { %v1539_v29 = vadd.f32 %v1463_v43, %v1393_v49  ;;  %v1465_v34 = vpop.f32.mrb[15].mxu0  ;;  %v1536_v35 = vpop.f32.mrb[15].mxu1  ;;  %v1541_v53 = vadd.f32 %v1534_v44, %v1395_v51 }
 0x83d   :  { %v1540_v36 = vadd.f32 %v1465_v34, %v1394_v28  ;;  %v1542_v56 = vadd.f32 %v1536_v35, %v1396_v54 }
 0x83e   :  { %v1610_v47 = vmul.f32 -1.442695, %v1539_v29  ;;  %v1612_v57 = vmul.f32 -1.442695, %v1541_v53 }
 0x83f   :  { %v1611_v50 = vmul.f32 -1.442695, %v1540_v36 }
 0x840   :  { %2246 = vpow2.f32 %v1610_v47 }
 0x841   :  { %2248 = vpow2.f32 %v1611_v50 }
 0x842   :  { %2250 = vtanh.f32 %v1542_v56 }
 0x843   :  { %2252 = vpow2.f32 %v1612_v57 }
 0x84a   :  { %v2247_v59 = vpop.eup %2246 }
 0x84b   :  { %v1546_v60 = vadd.f32 1.0, %v2247_v59  ;;  %v2249_v61 = vpop.eup %2248 }
 0x84c   :  { %v1552_v63 = vadd.f32 1.0, %v2249_v61  ;;  %v2251_v4 = vpop.eup %2250 }
 0x84d   :  { %2254 = vrcp.f32 %v1546_v60  ;;  %v2253_v2 = vpop.eup %2252 }
 0x84e   :  { %2256 = vrcp.f32 %v1552_v63  ;;  %v1558_v6 = vadd.f32 1.0, %v2253_v2 }
 0x850   :  { %2258 = vrcp.f32 %v1558_v6 }
 0x857   :  { %v2255_v22 = vpop.eup %2254 }
 0x858   :  { %v1563_v3 = vmul.f32 %v2255_v22, %v2251_v4  ;;  %v2257_v5 = vpop.eup %2256 }
 0x859   :  { %v1562_v11 = vmul.f32 %v2257_v5, %v1383_v32 }
 0x85a   :  { %v2259_v13 = vpop.eup %2258 }
 0x85b   :  { %v1564_v12 = vadd.f32 %v1563_v3, %v1562_v11 }
 0x85d   :  { %2260 = vtanh.f32 %v1564_v12 }
 0x867   :  { %v2261_v16 = vpop.eup %2260 }
 0x868   :  { %v1566_v19 = vmul.f32 %v2261_v16, %v2259_v13 }
 0x86a   :  { %1570 = vst [vmem:[#allocation10 + $0x38] sm:$0xff] %v1566_v19 }
 0x86b   :  { %2339 = shalt.err (!%p2336_p0)
}
 0x86c   :  { %s2340_s25 = scalar_lea.hbm %s2803_s3, 1024 }
 0x86d   :  { %p2341_p1 = scmp.ne.s32.totalorder %s2803_s3, %s2340_s25  ;;  %p2344_p2 = scmp.lt.u32.totalorder %s2340_s25, %s2803_s3 }
 0x86f   :  { %p2346_p3 = pnand %p2344_p2, %p2341_p1 }
 0x871   :  { %2349 = shalt.err (!%p2346_p3)
}
 0x872   :  { %s2363_s30 = smov 128   ;;  %s2364_s4 = smov 8  }
 0x873   :  { %1582 = dma.vmem_to_hbm [thread:$0]  %s1577_s21, 1024, %s2803_s3, [#allocation6], %s2363_s30, %s2363_s30, %s2364_s4  }
 0x874   :  { %2354 = dma.done.wait [#allocation6], 1024  }
 0x875   :  { %2355 = vsyncadd [#allocation6], 4294966272 }
 0x876   :  { %1586 = vsyncpa [#allocation5], 1 }
 0x877   :  { %1587 = vsyncpa [#allocation8], 1 }
 0x878   :  { %1588 = vsyncpa [#allocation6], 1 }

</bundles_post_ra>
